<compile_context>
chip_gen: v6e
topology: v6e:2x2x1
jax: 0.10.0
libtpu: 0.0.40
codegen_flags: <defaults>
</compile_context>

<pallas_src>
import jax
import jax.numpy as jnp
from jax.experimental import pallas as pl
from jax.experimental.pallas import tpu as pltpu

STATE_SIZE = 3     # Pendulum-v1 observation dim
ACTION_SIZE = 1    # Pendulum-v1 action dim
H1 = 512
H2 = 64
HEAD_PAD = 128     # lane-dense fused head width (cols [0,A)=mu, [A,2A)=logvar)
MAX_TILE_B = 2048  # per-grid-step batch tile cap (per review: fewer, bigger steps)


def _round_up(n, m):
    return ((n + m - 1) // m) * m


def _cdiv(a, b):
    return -(-a // b)


def _choose_tiling(batch):
    """Tile the batch into as few 128-aligned tiles as possible (<=2048 rows),
    keeping an even tile count >= 2 for batches > 128 so v7x's two
    TensorCores both get work via the "parallel" grid axis."""
    n_tiles = max(1, _cdiv(batch, MAX_TILE_B))
    if batch > 128 and n_tiles < 2:
        n_tiles = 2
    if n_tiles > 1 and (n_tiles % 2):
        n_tiles += 1
    tile_b = _round_up(_cdiv(batch, n_tiles), 128)
    return tile_b, n_tiles


def _policy_kernel(x_ref, w1_ref, b1_ref, w2_ref, b2_ref, wh_ref, bh_ref,
                   out_ref):
    x = x_ref[...]                      # (tile_b, 3) f32
    w1 = w1_ref[...]                    # (3, H1)     f32

    # ---- fc1 + relu on the VPU: K=3 broadcast FMAs (no MXU pass) ----
    h1 = (x[:, 0:1] * w1[0:1, :]
          + x[:, 1:2] * w1[1:2, :]
          + x[:, 2:3] * w1[2:3, :]
          + b1_ref[...])
    h1 = jnp.maximum(h1, 0.0)           # (tile_b, H1) f32

    # ---- fc2 + relu on the MXU (bf16 operands by default, f32 accum) ----
    w2 = w2_ref[...]
    h2 = jnp.dot(h1.astype(w2.dtype), w2,
                 preferred_element_type=jnp.float32) + b2_ref[...]
    h2 = jnp.maximum(h2, 0.0)           # (tile_b, H2) f32

    # ---- fused heads: one lane-dense (tile_b, 128) matmul ----
    wh = wh_ref[...]
    head = jnp.dot(h2.astype(wh.dtype), wh,
                   preferred_element_type=jnp.float32) + bh_ref[...]

    # ---- transpose on the (idle) XLU so the output store is lane-dense ----
    head_t = jnp.transpose(head)        # (HEAD_PAD, tile_b) f32

    # Only the first 2*A rows are useful: row 0 = mu-pre, row 1 = logvar-pre.
    mu_rows = jnp.tanh(head_t[0:ACTION_SIZE, :]) * 2.0
    lv_rows = jnp.clip(head_t[ACTION_SIZE:2 * ACTION_SIZE, :], -20.0, 2.0)
    out_ref[0:ACTION_SIZE, :] = mu_rows.astype(out_ref.dtype)
    out_ref[ACTION_SIZE:2 * ACTION_SIZE, :] = jnp.exp(lv_rows).astype(out_ref.dtype)


def prepare_params(params, use_bf16=True):
    """One-time parameter preparation (hoisted out of the per-step path):
    fuse the two 1-wide heads into a lane-dense (H2, 128) weight / (1, 128)
    bias and (optionally, default) cast the MXU-operand weights to bf16."""
    w1, b1, w2, b2, wmu, bmu, wlv, blv = params
    wh = (jnp.zeros((H2, HEAD_PAD), jnp.float32)
          .at[:, 0:ACTION_SIZE].set(wmu)
          .at[:, ACTION_SIZE:2 * ACTION_SIZE].set(wlv))
    bh = (jnp.zeros((1, HEAD_PAD), jnp.float32)
          .at[:, 0:ACTION_SIZE].set(bmu)
          .at[:, ACTION_SIZE:2 * ACTION_SIZE].set(blv))
    if use_bf16:
        # Only MXU operands narrow (halves the dominant w2 DMA); elementwise
        # math and accumulation stay f32 (no bf16 VPU/EUP on v5e).
        w2 = w2.astype(jnp.bfloat16)
        wh = wh.astype(jnp.bfloat16)
    return (w1, b1, w2, b2, wh, bh)


def _forward(x, prepared):
    w1, b1, w2, b2, wh, bh = prepared
    B = x.shape[0]

    tile_b, n_tiles = _choose_tiling(B)
    b_pad = tile_b * n_tiles
    if b_pad != B:
        x = jnp.pad(x, ((0, b_pad - B), (0, 0)))

    weight_bytes = sum(a.size * a.dtype.itemsize for a in (w1, b1, w2, b2, wh, bh))

    # VMEM budget sanity (review item): ~6 MiB at tile_b=2048, far under the
    # 32 MiB default scoped limit (v7x physical 64 MiB) -> tile size, not
    # VMEM, is the only constraint at these shapes.
    vmem_est = (2 * tile_b * STATE_SIZE * 4                 # x (double-buffered)
                + 2 * 2 * ACTION_SIZE * tile_b * 4          # out (double-buffered)
                + weight_bytes                              # VMEM-resident weights
                + tile_b * H1 * 4                           # h1 live value
                + 2 * tile_b * HEAD_PAD * 4)                # head + head_t
    assert vmem_est < 24 * 1024 * 1024, vmem_est

    cost = pl.CostEstimate(
        flops=2 * b_pad * (STATE_SIZE * H1 + H1 * H2 + H2 * HEAD_PAD),
        transcendentals=2 * ACTION_SIZE * b_pad,
        bytes_accessed=(b_pad * STATE_SIZE * 4 + weight_bytes
                        + 2 * ACTION_SIZE * b_pad * 4),
    )

    const = lambda i: (0, 0)
    out = pl.pallas_call(
        _policy_kernel,
        out_shape=jax.ShapeDtypeStruct((2 * ACTION_SIZE, b_pad), jnp.float32),
        grid=(n_tiles,),
        in_specs=[
            pl.BlockSpec((tile_b, STATE_SIZE), lambda i: (i, 0)),   # x
            pl.BlockSpec((STATE_SIZE, H1), const),                  # w1
            pl.BlockSpec((1, H1), const),                           # b1
            pl.BlockSpec((H1, H2), const),                          # w2
            pl.BlockSpec((1, H2), const),                           # b2
            pl.BlockSpec((H2, HEAD_PAD), const),                    # fused head W
            pl.BlockSpec((1, HEAD_PAD), const),                     # fused head b
        ],
        out_specs=pl.BlockSpec((2 * ACTION_SIZE, tile_b), lambda i: (0, i)),
        compiler_params=pltpu.CompilerParams(
            dimension_semantics=("parallel",)),   # v7x: both TCs take batch tiles
        cost_estimate=cost,
    )(x, w1, b1, w2, b2, wh, bh)

    mu = out[0:ACTION_SIZE, :B].T                       # (B, A)
    sigma = out[ACTION_SIZE:2 * ACTION_SIZE, :B].T      # (B, A)
    return mu, sigma


policy_gradient_nn_forward = jax.jit(_forward)


def init_params(key):
    """Deterministic init mirroring nn.Linear shapes (weights pre-transposed
    to (in, out); biases kept 2D (1, out) for TPU-friendly layout)."""
    def linear(k, fan_in, fan_out):
        kw, kb = jax.random.split(k)
        bound = 1.0 / jnp.sqrt(jnp.float32(fan_in))
        w = jax.random.uniform(kw, (fan_in, fan_out), jnp.float32, -bound, bound)
        b = jax.random.uniform(kb, (1, fan_out), jnp.float32, -bound, bound)
        return w, b

    k1, k2, k3, k4 = jax.random.split(key, 4)
    w1, b1 = linear(k1, STATE_SIZE, H1)        # fc1: Linear(3, 512)
    w2, b2 = linear(k2, H1, H2)                # fc2: Linear(512, 64)
    wmu, bmu = linear(k3, H2, ACTION_SIZE)     # fc4_mu: Linear(64, 1)
    wlv, blv = linear(k4, H2, ACTION_SIZE)     # fc4_logvar: Linear(64, 1)
    return (w1, b1, w2, b2, wmu, bmu, wlv, blv)


def _reference_forward(x, params):
    w1, b1, w2, b2, wmu, bmu, wlv, blv = params
    h1 = jnp.maximum(x @ w1 + b1, 0.0)
    h2 = jnp.maximum(h1 @ w2 + b2, 0.0)
    mu = jnp.tanh(h2 @ wmu + bmu) * 2.0
    logvar = jnp.clip(h2 @ wlv + blv, -20.0, 2.0)
    return mu, jnp.exp(logvar)


if __name__ == "__main__":
    key = jax.random.PRNGKey(0)
    k_params, k_x = jax.random.split(key)

    params = init_params(k_params)
    prepared_f32 = prepare_params(params, use_bf16=False)   # exact-check path
    prepared_bf16 = prepare_params(params, use_bf16=True)   # default fast path
    jax.block_until_ready((prepared_f32, prepared_bf16))

    # Small per-step batch (matches the RL acting path).
    batch = 8
    x = jax.random.normal(k_x, (batch, STATE_SIZE), jnp.float32)
    mu, sigma = policy_gradient_nn_forward(x, prepared_f32)
    jax.block_until_ready((mu, sigma))

    mu_ref, sigma_ref = _reference_forward(x, params)
    assert mu.shape == (batch, ACTION_SIZE) and sigma.shape == (batch, ACTION_SIZE)
    assert jnp.allclose(mu, mu_ref, atol=1e-5, rtol=1e-5)
    assert jnp.allclose(sigma, sigma_ref, atol=1e-5, rtol=1e-5)

    # Larger rollout batch exercising the multi-tile grid (padding + 2 tiles).
    xb = jax.random.normal(k_x, (1000, STATE_SIZE), jnp.float32)
    mu_b, sigma_b = policy_gradient_nn_forward(xb, prepared_f32)
    jax.block_until_ready((mu_b, sigma_b))
    mu_bref, sigma_bref = _reference_forward(xb, params)
    assert jnp.allclose(mu_b, mu_bref, atol=1e-5, rtol=1e-5)
    assert jnp.allclose(sigma_b, sigma_bref, atol=1e-5, rtol=1e-5)

    # Default bf16-MXU-operand path (f32 accumulation; elementwise stays f32).
    mu16, sigma16 = policy_gradient_nn_forward(xb, prepared_bf16)
    jax.block_until_ready((mu16, sigma16))
    assert jnp.allclose(mu16, mu_bref, atol=5e-2, rtol=5e-2)
    assert jnp.allclose(sigma16, sigma_bref, atol=5e-2, rtol=5e-2)

    print("KERNEL_OK")
</pallas_src>

<mosaic_0001>
module attributes {stable_mosaic.version = 11 : i64} {
  func.func @_policy_kernel(%arg0: i32, %arg1: memref<128x3xf32, #tpu.memory_space<vmem>>, %arg2: memref<3x512xf32, #tpu.memory_space<vmem>>, %arg3: memref<1x512xf32, #tpu.memory_space<vmem>>, %arg4: memref<512x64xf32, #tpu.memory_space<vmem>>, %arg5: memref<1x64xf32, #tpu.memory_space<vmem>>, %arg6: memref<64x128xf32, #tpu.memory_space<vmem>>, %arg7: memref<1x128xf32, #tpu.memory_space<vmem>>, %arg8: memref<2x128xf32, #tpu.memory_space<vmem>>) attributes {dimension_semantics = [#tpu.dimension_semantics<parallel>], iteration_bounds = array<i64: 1>, scalar_prefetch = 0 : i64, scratch_operands = 0 : i64, tpu.core_type = #tpu.core_type<tc>, window_params = [{transform_indices = @transform_0, window_bounds = array<i64: 128, 3>}, {pipeline_mode = #tpu.pipeline_mode<synchronous>, transform_indices = @transform_1, window_bounds = array<i64: 3, 512>}, {pipeline_mode = #tpu.pipeline_mode<synchronous>, transform_indices = @transform_2, window_bounds = array<i64: 1, 512>}, {pipeline_mode = #tpu.pipeline_mode<synchronous>, transform_indices = @transform_3, window_bounds = array<i64: 512, 64>}, {pipeline_mode = #tpu.pipeline_mode<synchronous>, transform_indices = @transform_4, window_bounds = array<i64: 1, 64>}, {pipeline_mode = #tpu.pipeline_mode<synchronous>, transform_indices = @transform_5, window_bounds = array<i64: 64, 128>}, {pipeline_mode = #tpu.pipeline_mode<synchronous>, transform_indices = @transform_6, window_bounds = array<i64: 1, 128>}, {transform_indices = @transform_7, window_bounds = array<i64: 2, 128>}]} {
    %c0 = arith.constant 0 : index
    %c0_0 = arith.constant 0 : index
    %0 = vector.load %arg1[%c0, %c0_0] : memref<128x3xf32, #tpu.memory_space<vmem>>, vector<128x3xf32>
    %c0_1 = arith.constant 0 : index
    %c0_2 = arith.constant 0 : index
    %1 = vector.load %arg2[%c0_1, %c0_2] : memref<3x512xf32, #tpu.memory_space<vmem>>, vector<3x512xf32>
    %2 = vector.extract_strided_slice %0 {offsets = [0, 0], sizes = [128, 1], strides = [1, 1]} : vector<128x3xf32> to vector<128x1xf32>
    %3 = vector.extract_strided_slice %1 {offsets = [0, 0], sizes = [1, 512], strides = [1, 1]} : vector<3x512xf32> to vector<1x512xf32>
    %4 = vector.broadcast %2 : vector<128x1xf32> to vector<128x512xf32>
    %5 = vector.broadcast %3 : vector<1x512xf32> to vector<128x512xf32>
    %6 = arith.mulf %4, %5 : vector<128x512xf32>
    %7 = vector.extract_strided_slice %0 {offsets = [0, 1], sizes = [128, 1], strides = [1, 1]} : vector<128x3xf32> to vector<128x1xf32>
    %8 = vector.extract_strided_slice %1 {offsets = [1, 0], sizes = [1, 512], strides = [1, 1]} : vector<3x512xf32> to vector<1x512xf32>
    %9 = vector.broadcast %7 : vector<128x1xf32> to vector<128x512xf32>
    %10 = vector.broadcast %8 : vector<1x512xf32> to vector<128x512xf32>
    %11 = arith.mulf %9, %10 : vector<128x512xf32>
    %12 = arith.addf %6, %11 : vector<128x512xf32>
    %13 = vector.extract_strided_slice %0 {offsets = [0, 2], sizes = [128, 1], strides = [1, 1]} : vector<128x3xf32> to vector<128x1xf32>
    %14 = vector.extract_strided_slice %1 {offsets = [2, 0], sizes = [1, 512], strides = [1, 1]} : vector<3x512xf32> to vector<1x512xf32>
    %15 = vector.broadcast %13 : vector<128x1xf32> to vector<128x512xf32>
    %16 = vector.broadcast %14 : vector<1x512xf32> to vector<128x512xf32>
    %17 = arith.mulf %15, %16 : vector<128x512xf32>
    %18 = arith.addf %12, %17 : vector<128x512xf32>
    %c0_3 = arith.constant 0 : index
    %c0_4 = arith.constant 0 : index
    %19 = vector.load %arg3[%c0_3, %c0_4] : memref<1x512xf32, #tpu.memory_space<vmem>>, vector<1x512xf32>
    %20 = vector.broadcast %19 : vector<1x512xf32> to vector<128x512xf32>
    %21 = arith.addf %18, %20 : vector<128x512xf32>
    %cst = arith.constant 0.000000e+00 : f32
    %22 = vector.broadcast %cst : f32 to vector<128x512xf32>
    %23 = arith.maximumf %21, %22 : vector<128x512xf32>
    %c0_5 = arith.constant 0 : index
    %c0_6 = arith.constant 0 : index
    %24 = vector.load %arg4[%c0_5, %c0_6] : memref<512x64xf32, #tpu.memory_space<vmem>>, vector<512x64xf32>
    %cst_7 = arith.constant dense<0.000000e+00> : vector<128x64xf32>
    %25 = tpu.matmul %23, %24, %cst_7 {dimension_numbers = #tpu.dot_dimension_numbers<[1], [0], [0], [1], [0, 0, 1, 1], [], []>} : vector<128x512xf32>, vector<512x64xf32>, vector<128x64xf32> -> vector<128x64xf32>
    %c0_8 = arith.constant 0 : index
    %c0_9 = arith.constant 0 : index
    %26 = vector.load %arg5[%c0_8, %c0_9] : memref<1x64xf32, #tpu.memory_space<vmem>>, vector<1x64xf32>
    %27 = vector.broadcast %26 : vector<1x64xf32> to vector<128x64xf32>
    %28 = arith.addf %25, %27 : vector<128x64xf32>
    %cst_10 = arith.constant 0.000000e+00 : f32
    %29 = vector.broadcast %cst_10 : f32 to vector<128x64xf32>
    %30 = arith.maximumf %28, %29 : vector<128x64xf32>
    %c0_11 = arith.constant 0 : index
    %c0_12 = arith.constant 0 : index
    %31 = vector.load %arg6[%c0_11, %c0_12] : memref<64x128xf32, #tpu.memory_space<vmem>>, vector<64x128xf32>
    %cst_13 = arith.constant dense<0.000000e+00> : vector<128x128xf32>
    %32 = tpu.matmul %30, %31, %cst_13 {dimension_numbers = #tpu.dot_dimension_numbers<[1], [0], [0], [1], [0, 0, 1, 1], [], []>} : vector<128x64xf32>, vector<64x128xf32>, vector<128x128xf32> -> vector<128x128xf32>
    %c0_14 = arith.constant 0 : index
    %c0_15 = arith.constant 0 : index
    %33 = vector.load %arg7[%c0_14, %c0_15] : memref<1x128xf32, #tpu.memory_space<vmem>>, vector<1x128xf32>
    %34 = vector.broadcast %33 : vector<1x128xf32> to vector<128x128xf32>
    %35 = arith.addf %32, %34 : vector<128x128xf32>
    %36 = tpu.transpose %35, [1, 0] : vector<128x128xf32> -> vector<128x128xf32>
    %37 = vector.extract_strided_slice %36 {offsets = [0, 0], sizes = [1, 128], strides = [1, 1]} : vector<128x128xf32> to vector<1x128xf32>
    %38 = math.tanh %37 : vector<1x128xf32>
    %cst_16 = arith.constant 2.000000e+00 : f32
    %39 = vector.broadcast %cst_16 : f32 to vector<1x128xf32>
    %40 = arith.mulf %38, %39 : vector<1x128xf32>
    %41 = vector.extract_strided_slice %36 {offsets = [1, 0], sizes = [1, 128], strides = [1, 1]} : vector<128x128xf32> to vector<1x128xf32>
    %cst_17 = arith.constant -2.000000e+01 : f32
    %cst_18 = arith.constant 2.000000e+00 : f32
    %42 = vector.broadcast %cst_17 : f32 to vector<1x128xf32>
    %43 = arith.maximumf %42, %41 : vector<1x128xf32>
    %44 = vector.broadcast %cst_18 : f32 to vector<1x128xf32>
    %45 = arith.minimumf %44, %43 : vector<1x128xf32>
    %c0_19 = arith.constant 0 : index
    %c0_20 = arith.constant 0 : index
    %46 = vector.load %arg8[%c0_19, %c0_20] : memref<2x128xf32, #tpu.memory_space<vmem>>, vector<1x128xf32>
    tpu.vector_store %arg8[%c0_19, %c0_20], %40 {strides = array<i32>} : memref<2x128xf32, #tpu.memory_space<vmem>>, vector<1x128xf32>,
    %47 = math.exp %45 : vector<1x128xf32>
    %c1 = arith.constant 1 : index
    %c0_21 = arith.constant 0 : index
    %48 = vector.load %arg8[%c1, %c0_21] : memref<2x128xf32, #tpu.memory_space<vmem>>, vector<1x128xf32>
    tpu.vector_store %arg8[%c1, %c0_21], %47 {strides = array<i32>} : memref<2x128xf32, #tpu.memory_space<vmem>>, vector<1x128xf32>,
    return
  }
  func.func @transform_0(%arg0: i32) -> (i32, i32) {
    %c0_i32 = arith.constant 0 : i32
    %c0_i32_0 = arith.constant 0 : i32
    return %arg0, %c0_i32 : i32, i32
  }
  func.func @transform_1(%arg0: i32) -> (i32, i32) {
    %c0_i32 = arith.constant 0 : i32
    %c0_i32_0 = arith.constant 0 : i32
    %c0_i32_1 = arith.constant 0 : i32
    return %c0_i32, %c0_i32_0 : i32, i32
  }
  func.func @transform_2(%arg0: i32) -> (i32, i32) {
    %c0_i32 = arith.constant 0 : i32
    %c0_i32_0 = arith.constant 0 : i32
    %c0_i32_1 = arith.constant 0 : i32
    return %c0_i32, %c0_i32_0 : i32, i32
  }
  func.func @transform_3(%arg0: i32) -> (i32, i32) {
    %c0_i32 = arith.constant 0 : i32
    %c0_i32_0 = arith.constant 0 : i32
    %c0_i32_1 = arith.constant 0 : i32
    return %c0_i32, %c0_i32_0 : i32, i32
  }
  func.func @transform_4(%arg0: i32) -> (i32, i32) {
    %c0_i32 = arith.constant 0 : i32
    %c0_i32_0 = arith.constant 0 : i32
    %c0_i32_1 = arith.constant 0 : i32
    return %c0_i32, %c0_i32_0 : i32, i32
  }
  func.func @transform_5(%arg0: i32) -> (i32, i32) {
    %c0_i32 = arith.constant 0 : i32
    %c0_i32_0 = arith.constant 0 : i32
    %c0_i32_1 = arith.constant 0 : i32
    return %c0_i32, %c0_i32_0 : i32, i32
  }
  func.func @transform_6(%arg0: i32) -> (i32, i32) {
    %c0_i32 = arith.constant 0 : i32
    %c0_i32_0 = arith.constant 0 : i32
    %c0_i32_1 = arith.constant 0 : i32
    return %c0_i32, %c0_i32_0 : i32, i32
  }
  func.func @transform_7(%arg0: i32) -> (i32, i32) {
    %c0_i32 = arith.constant 0 : i32
    %c0_i32_0 = arith.constant 0 : i32
    return %c0_i32, %arg0 : i32, i32
  }
}

</mosaic_0001>

<bundles_post_ra>
// kernel: _forward.1
= control target key start
LH: loop header
LB: loop body
LE: loop exit
PB: predicated region body
PF: predicated region fallthrough
CT: control target
= control target key end

     0   :  { %v2594_v0 = vmov 2   ;;  %v1765_v1 = vmov 0   ;;  %v1766_v14 = vmov 1   ;;  %vm1224_vm0 = vcmask 523264   ;;  %s2586_s0 = inlined_call_operand.vmem [shape: f32[128,3], index: 0, kind: input, shape index: {}]   ;;  %s2587_s3 = inlined_call_operand.vmem [shape: f32[512,64], index: 3, kind: input, shape index: {}]   ;;  %s2588_s1 = inlined_call_operand.vmem [shape: f32[3,512], index: 1, kind: input, shape index: {}]   ;;  %s2589_s2 = inlined_call_operand.vmem [shape: f32[1,512], index: 2, kind: input, shape index: {}]   ;;  %s2590_s5 = inlined_call_operand.vmem [shape: f32[64,128], index: 5, kind: input, shape index: {}]   ;;  %s2591_s4 = inlined_call_operand.vmem [shape: f32[1,64], index: 4, kind: input, shape index: {}]   ;;  %s2592_s6 = inlined_call_operand.vmem [shape: f32[1,128], index: 6, kind: input, shape index: {}]   ;;  %s2593_s7 = inlined_call_operand.vmem [shape: f32[2,128], index: 7, kind: output, shape index: {}]  }
   0x1   :  { %1724 = vset.pattern.permute.xlu1 %v2594_v0  ;;  %1723 = vset.pattern.permute.xlu0 %v1765_v1  ;;  %v1812_v2 = vld [vmem:[%s2586_s0] sm:$0xff]  ;;  %v27_v3 = vld [vmem:[%s2586_s0 + $0x8] sm:$0xff]  ;;  %v863_v4 = vld [vmem:[%s2587_s3 + $0xf8] sm:$0xff] }
   0x2   :  { %455 = vperm.xlu1 %1724, %v1812_v2   ;;  %46 = vperm.xlu0 %1723, %v1812_v2   ;;  %v895_v5 = vld [vmem:[%s2587_s3 + $0x1f8] sm:$0xff]  ;;  %v28_v8 = vld [vmem:[%s2586_s0 + $0x10] sm:$0xff]  ;;  %v861_v13 = vld [vmem:[%s2587_s3 + $0xe8] sm:$0xff] }
   0x3   :  { %v847_v6 = vld [vmem:[%s2587_s3 + $0x78] sm:$0xff]  ;;  %1480 = vmatprep.subr.mxu0 %v863_v4  ;;  %1560 = vmatprep.subr.mxu1 %v895_v5  ;;  %v862_v9 = vld [vmem:[%s2587_s3 + $0xf0] sm:$0xff]  ;;  %v893_v15 = vld [vmem:[%s2587_s3 + $0x1e8] sm:$0xff] }
   0x4   :  { %v879_v7 = vld [vmem:[%s2587_s3 + $0x178] sm:$0xff]  ;;  %v894_v10 = vld [vmem:[%s2587_s3 + $0x1f0] sm:$0xff]  ;;  %1481 = vmatpush3.msra.mxu0 %v847_v6  ;;  %v845_v16 = vld [vmem:[%s2587_s3 + $0x68] sm:$0xff] }
   0x5   :  { %1561 = vmatpush3.msra.mxu1 %v879_v7  ;;  %v846_v11 = vld [vmem:[%s2587_s3 + $0x70] sm:$0xff]  ;;  %1482 = vmatprep.subr.mxu0 %v862_v9  ;;  %v877_v18 = vld [vmem:[%s2587_s3 + $0x168] sm:$0xff]  ;;  %v860_v19 = vld [vmem:[%s2587_s3 + $0xe0] sm:$0xff] }
   0x6   :  { %1725 = vset.pattern.permute.xlu1 %v1765_v1  ;;  %1727 = vset.pattern.permute.xlu0 %v2594_v0  ;;  %v878_v12 = vld [vmem:[%s2587_s3 + $0x170] sm:$0xff]  ;;  %v892_v20 = vld [vmem:[%s2587_s3 + $0x1e0] sm:$0xff]  ;;  %v1883_v23 = vld [vmem:[%s2586_s0 + $0x38] sm:$0xff] }
   0x7   :  { %51 = vperm.xlu1 %1725, %v27_v3   ;;  %459 = vperm.xlu0 %1727, %v27_v3   ;;  %v1861_v17 = vld [vmem:[%s2586_s0 + $0x30] sm:$0xff]  ;;  %v844_v21 = vld [vmem:[%s2587_s3 + $0x60] sm:$0xff]  ;;  %v859_v24 = vld [vmem:[%s2587_s3 + $0xd8] sm:$0xff] }
   0x8   :  { %1562 = vmatprep.subr.mxu1 %v894_v10  ;;  %1483 = vmatpush3.msra.mxu0 %v846_v11  ;;  %v876_v22 = vld [vmem:[%s2587_s3 + $0x160] sm:$0xff]  ;;  %v891_v25 = vld [vmem:[%s2587_s3 + $0x1d8] sm:$0xff]  ;;  %v858_v28 = vld [vmem:[%s2587_s3 + $0xd0] sm:$0xff] }
   0x9   :  { %1563 = vmatpush3.msra.mxu1 %v878_v12  ;;  %1484 = vmatprep.subr.mxu0 %v861_v13  ;;  %v843_v26 = vld [vmem:[%s2587_s3 + $0x58] sm:$0xff]  ;;  %v890_v29 = vld [vmem:[%s2587_s3 + $0x1d0] sm:$0xff]  ;;  %v857_v32 = vld [vmem:[%s2587_s3 + $0xc8] sm:$0xff] }
   0xa   :  { %1564 = vmatprep.subr.mxu1 %v893_v15  ;;  %1485 = vmatpush3.msra.mxu0 %v845_v16  ;;  %v875_v27 = vld [vmem:[%s2587_s3 + $0x158] sm:$0xff]  ;;  %v842_v30 = vld [vmem:[%s2587_s3 + $0x50] sm:$0xff]  ;;  %v889_v33 = vld [vmem:[%s2587_s3 + $0x1c8] sm:$0xff] }
   0xb   :  { %1726 = vset.pattern.permute.xlu1 %v1766_v14  ;;  %463 = vperm.xlu0 %1727, %v28_v8   ;;  %v874_v31 = vld [vmem:[%s2587_s3 + $0x150] sm:$0xff]  ;;  %v29_v34 = vld [vmem:[%s2586_s0 + $0x18] sm:$0xff]  ;;  %v841_v35 = vld [vmem:[%s2587_s3 + $0x48] sm:$0xff] }
   0xc   :  { %231 = vperm.xlu1 %1726, %v27_v3   ;;  %1565 = vmatpush3.msra.mxu1 %v877_v18  ;;  %v873_v36 = vld [vmem:[%s2587_s3 + $0x148] sm:$0xff]  ;;  %v856_v37 = vld [vmem:[%s2587_s3 + $0xc0] sm:$0xff]  ;;  %v855_v41 = vld [vmem:[%s2587_s3 + $0xb8] sm:$0xff] }
   0xd   :  { %1486 = vmatprep.subr.mxu0 %v860_v19  ;;  %1566 = vmatprep.subr.mxu1 %v892_v20  ;;  %v888_v38 = vld [vmem:[%s2587_s3 + $0x1c0] sm:$0xff]  ;;  %v887_v43 = vld [vmem:[%s2587_s3 + $0x1b8] sm:$0xff]  ;;  %v854_v46 = vld [vmem:[%s2587_s3 + $0xb0] sm:$0xff] }
   0xe   :  { %1487 = vmatpush3.msra.mxu0 %v844_v21  ;;  %1567 = vmatpush3.msra.mxu1 %v876_v22  ;;  %v840_v39 = vld [vmem:[%s2587_s3 + $0x40] sm:$0xff]  ;;  %v839_v44 = vld [vmem:[%s2587_s3 + $0x38] sm:$0xff]  ;;  %v886_v47 = vld [vmem:[%s2587_s3 + $0x1b0] sm:$0xff]  ;;  %v126_v22 = vlaneseq }
   0xf   :  { %479 = vperm.xlu0 %1727, %v1861_v17   ;;  %1488 = vmatprep.subr.mxu0 %v859_v24  ;;  %v872_v40 = vld [vmem:[%s2587_s3 + $0x140] sm:$0xff]  ;;  %v871_v45 = vld [vmem:[%s2587_s3 + $0x138] sm:$0xff]  ;;  %v838_v48 = vld [vmem:[%s2587_s3 + $0x30] sm:$0xff] }
  0x10   :  { %1728 = vset.pattern.permute.xlu1 %v1765_v1  ;;  %1568 = vmatprep.subr.mxu1 %v891_v25  ;;  %v30_v42 = vld [vmem:[%s2586_s0 + $0x20] sm:$0xff]  ;;  %v870_v50 = vld [vmem:[%s2587_s3 + $0x130] sm:$0xff]  ;;  %v853_v51 = vld [vmem:[%s2587_s3 + $0xa8] sm:$0xff] }
  0x11   :  { %56 = vperm.xlu1 %1728, %v28_v8   ;;  %1489 = vmatpush3.msra.mxu0 %v843_v26  ;;  %v1969_v49 = vld [vmem:[%s2586_s0 + $0x40] sm:$0xff]  ;;  %v885_v52 = vld [vmem:[%s2587_s3 + $0x1a8] sm:$0xff]  ;;  %v851_v60 = vld [vmem:[%s2587_s3 + $0x98] sm:$0xff] }
  0x12   :  { %1569 = vmatpush3.msra.mxu1 %v875_v27  ;;  %1490 = vmatprep.subr.mxu0 %v858_v28  ;;  %v837_v53 = vld [vmem:[%s2587_s3 + $0x28] sm:$0xff]  ;;  %v852_v56 = vld [vmem:[%s2587_s3 + $0xa0] sm:$0xff]  ;;  %v883_v61 = vld [vmem:[%s2587_s3 + $0x198] sm:$0xff] }
  0x13   :  { %483 = vperm.xlu0 %1727, %v1883_v23   ;;  %1570 = vmatprep.subr.mxu1 %v890_v29  ;;  %v869_v54 = vld [vmem:[%s2587_s3 + $0x128] sm:$0xff]  ;;  %v884_v57 = vld [vmem:[%s2587_s3 + $0x1a0] sm:$0xff]  ;;  %v835_v63 = vld [vmem:[%s2587_s3 + $0x18] sm:$0xff] }
  0x14   :  { %1491 = vmatpush3.msra.mxu0 %v842_v30  ;;  %1571 = vmatpush3.msra.mxu1 %v874_v31  ;;  %v1991_v55 = vld [vmem:[%s2586_s0 + $0x48] sm:$0xff]  ;;  %v836_v58 = vld [vmem:[%s2587_s3 + $0x20] sm:$0xff]  ;;  %v850_v3 = vld [vmem:[%s2587_s3 + $0x90] sm:$0xff] }
  0x15   :  { %1729 = vset.pattern.permute.xlu1 %v1766_v14  ;;  %1492 = vmatprep.subr.mxu0 %v857_v32  ;;  %v868_v59 = vld [vmem:[%s2587_s3 + $0x120] sm:$0xff]  ;;  %v31_v62 = vld [vmem:[%s2586_s0 + $0x28] sm:$0xff]  ;;  %v882_v4 = vld [vmem:[%s2587_s3 + $0x190] sm:$0xff] }
  0x16   :  { %235 = vperm.xlu1 %1729, %v28_v8   ;;  %1572 = vmatprep.subr.mxu1 %v889_v33  ;;  %v834_v5 = vld [vmem:[%s2587_s3 + $0x10] sm:$0xff]  ;;  %v849_v7 = vld [vmem:[%s2587_s3 + $0x88] sm:$0xff]  ;;  %v848_v12 = vld [vmem:[%s2587_s3 + $0x80] sm:$0xff] }
  0x17   :  { %1739 = vset.pattern.permute.xlu0 %v1766_v14  ;;  %1493 = vmatpush3.msra.mxu0 %v841_v35  ;;  %v866_v6 = vld [vmem:[%s2587_s3 + $0x110] sm:$0xff]  ;;  %v881_v8 = vld [vmem:[%s2587_s3 + $0x188] sm:$0xff]  ;;  %v880_v13 = vld [vmem:[%s2587_s3 + $0x180] sm:$0xff] }
  0x18   :  { %227 = vperm.xlu0 %1739, %v1812_v2   ;;  %1573 = vmatpush3.msra.mxu1 %v873_v36  ;;  %v867_v2 = vld [vmem:[%s2587_s3 + $0x118] sm:$0xff]  ;;  %v833_v9 = vld [vmem:[%s2587_s3 + $0x8] sm:$0xff]  ;;  %v36_v11 = vld [vmem:[%s2586_s0 + $0x50] sm:$0xff] }
  0x19   :  { %1494 = vmatprep.subr.mxu0 %v856_v37  ;;  %1574 = vmatprep.subr.mxu1 %v888_v38  ;;  %v865_v10 = vld [vmem:[%s2587_s3 + $0x108] sm:$0xff]  ;;  %v832_v15 = vld [vmem:[%s2587_s3] sm:$0xff]  ;;  %v37_v18 = vld [vmem:[%s2586_s0 + $0x58] sm:$0xff] }
  0x1a   :  { %1730 = vset.pattern.permute.xlu1 %v1765_v1  ;;  %1495 = vmatpush3.msra.mxu0 %v840_v39  ;;  %v864_v16 = vld [vmem:[%s2587_s3 + $0x100] sm:$0xff]  ;;  %v40_v20 = vld [vmem:[%s2586_s0 + $0x70] sm:$0xff]  ;;  %v2092_v21 = vld [vmem:[%s2586_s0 + $0x78] sm:$0xff] }
  0x1b   :  { %61 = vperm.xlu1 %1730, %v29_v34   ;;  %1575 = vmatpush3.msra.mxu1 %v872_v40  ;;  %v38_v19 = vld [vmem:[%s2586_s0 + $0x60] sm:$0xff]  ;;  %v43_v30 = vld [vmem:[%s2588_s1 + $0x8] sm:$0x77] }
  0x1c   :  { %239 = vperm.xlu0 %1739, %v29_v34   ;;  %1496 = vmatprep.subr.mxu0 %v855_v41  ;;  %v42_v29 = vld [vmem:[%s2588_s1] sm:$0x77] }
  0x1d   :  { %1576 = vmatprep.subr.mxu1 %v887_v43  ;;  %1497 = vmatpush3.msra.mxu0 %v839_v44 }
  0x1e   :  { %1577 = vmatpush3.msra.mxu1 %v871_v45  ;;  %1498 = vmatprep.subr.mxu0 %v854_v46 }
  0x1f   :  { %1731 = vset.pattern.permute.xlu1 %v2594_v0  ;;  %1578 = vmatprep.subr.mxu1 %v886_v47 }
  0x20   :  { %467 = vperm.xlu1 %1731, %v29_v34   ;;  %243 = vperm.xlu0 %1739, %v30_v42  }
  0x21   :  { %1499 = vmatpush3.msra.mxu0 %v838_v48  ;;  %1579 = vmatpush3.msra.mxu1 %v870_v50 }
  0x22   :  { %1500 = vmatprep.subr.mxu0 %v853_v51  ;;  %1580 = vmatprep.subr.mxu1 %v885_v52 }
  0x23   :  { %1501 = vmatpush3.msra.mxu0 %v837_v53  ;;  %1581 = vmatpush3.msra.mxu1 %v869_v54 }
  0x24   :  { %1732 = vset.pattern.permute.xlu1 %v1765_v1  ;;  %259 = vperm.xlu0 %1739, %v1969_v49  }
  0x25   :  { %66 = vperm.xlu1 %1732, %v30_v42   ;;  %1502 = vmatprep.subr.mxu0 %v852_v56 }
  0x26   :  { %1582 = vmatprep.subr.mxu1 %v884_v57  ;;  %1503 = vmatpush3.msra.mxu0 %v836_v58 }
  0x27   :  { %1583 = vmatpush3.msra.mxu1 %v868_v59  ;;  %1504 = vmatprep.subr.mxu0 %v851_v60 }
  0x28   :  { %263 = vperm.xlu0 %1739, %v1991_v55   ;;  %1584 = vmatprep.subr.mxu1 %v883_v61 }
  0x29   :  { %1733 = vset.pattern.permute.xlu1 %v2594_v0  ;;  %1505 = vmatpush3.msra.mxu0 %v835_v63 }
  0x2a   :  { %471 = vperm.xlu1 %1733, %v30_v42   ;;  %1585 = vmatpush3.msra.mxu1 %v867_v2 }
  0x2b   :  { %1506 = vmatprep.subr.mxu0 %v850_v3  ;;  %1586 = vmatprep.subr.mxu1 %v882_v4 }
  0x2c   :  { %1743 = vset.pattern.permute.xlu0 %v1765_v1  ;;  %1507 = vmatpush3.msra.mxu0 %v834_v5 }
  0x2d   :  { %71 = vperm.xlu0 %1743, %v31_v62   ;;  %1587 = vmatpush3.msra.mxu1 %v866_v6 }
  0x2e   :  { %1734 = vset.pattern.permute.xlu1 %v1766_v14  ;;  %1508 = vmatprep.subr.mxu0 %v849_v7 }
  0x2f   :  { %247 = vperm.xlu1 %1734, %v31_v62   ;;  %1588 = vmatprep.subr.mxu1 %v881_v8 }
  0x30   :  { %1509 = vmatpush3.msra.mxu0 %v833_v9  ;;  %1589 = vmatpush3.msra.mxu1 %v865_v10 }
  0x31   :  { %76 = vperm.xlu0 %1743, %v1861_v17   ;;  %1510 = vmatprep.subr.mxu0 %v848_v12 }
  0x32   :  { %1590 = vmatprep.subr.mxu1 %v880_v13  ;;  %1511 = vmatpush3.msra.mxu0 %v832_v15 }
  0x33   :  { %1735 = vset.pattern.permute.xlu1 %v2594_v0  ;;  %1591 = vmatpush3.msra.mxu1 %v864_v16 }
  0x34   :  { %475 = vperm.xlu1 %1735, %v31_v62  }
  0x35   :  { %96 = vperm.xlu0 %1743, %v36_v11  }
  0x38   :  { %1736 = vset.pattern.permute.xlu1 %v1766_v14 }
  0x39   :  { %251 = vperm.xlu1 %1736, %v1861_v17   ;;  %101 = vperm.xlu0 %1743, %v37_v18   ;;  %v39_v17 = vld [vmem:[%s2586_s0 + $0x68] sm:$0xff] }
  0x3d   :  { %1737 = vset.pattern.permute.xlu1 %v1765_v1  ;;  %1748 = vset.pattern.permute.xlu0 %v2594_v0 }
  0x3e   :  { %81 = vperm.xlu1 %1737, %v1883_v23   ;;  %499 = vperm.xlu0 %1748, %v37_v18  }
  0x42   :  { %1738 = vset.pattern.permute.xlu1 %v1766_v14  ;;  %503 = vperm.xlu0 %1748, %v38_v19  }
  0x43   :  { %255 = vperm.xlu1 %1738, %v1883_v23   ;;  %v127_v23 = vshrl.u32 %v126_v22, 7 }
  0x45   :  { %v296_v24 = vsub.s32 5, %v127_v23  ;;  %v132_v27 = vsub.s32 4, %v127_v23  ;;  %v292_v28 = vsub.s32 1, %v127_v23  ;;  %v520_v31 = vsub.s32 2, %v127_v23 }
  0x46   :  { %1752 = vset.pattern.permute.xlu0 %v1766_v14  ;;  %v128_v32 = vsub.s32 0, %v127_v23  ;;  %v524_v33 = vsub.s32 6, %v127_v23 }
  0x47   :  { %1740 = vset.pattern.permute.xlu1 %v1765_v1  ;;  %279 = vperm.xlu0 %1752, %v39_v17   ;;  %v297_v34 = vrot.slane %v42_v29, %v296_v24  ;;  %v305_v35 = vrot.slane %v43_v30, %v296_v24  ;;  %v133_v36 = vrot.slane %v42_v29, %v132_v27 }
  0x48   :  { %86 = vperm.xlu1 %1740, %v1969_v49   ;;  %v141_v37 = vrot.slane %v43_v30, %v132_v27  ;;  %v293_v39 = vrot.slane %v42_v29, %v292_v28  ;;  %v301_v40 = vrot.slane %v43_v30, %v292_v28  ;;  %v521_v41 = vrot.slane %v42_v29, %v520_v31 }
  0x49   :  { %v129_v42 = vrot.slane %v42_v29, %v128_v32  ;;  %v137_v43 = vrot.slane %v43_v30, %v128_v32  ;;  %v529_v44 = vrot.slane %v43_v30, %v520_v31  ;;  %v525_v45 = vrot.slane %v42_v29, %v524_v33 }
  0x4a   :  { %v2119_v46 = vrot.slane %v297_v34, %v292_v28  ;;  %v2121_v47 = vrot.slane %v305_v35, %v292_v28  ;;  %v533_v48 = vrot.slane %v43_v30, %v524_v33  ;;  %v2123_v50 = vrot.slane %v133_v36, %v128_v32 }
  0x4b   :  { %283 = vperm.xlu0 %1752, %v40_v20   ;;  %v2125_v51 = vrot.slane %v141_v37, %v128_v32  ;;  %v2127_v52 = vrot.slane %v293_v39, %v292_v28  ;;  %v2129_v53 = vrot.slane %v301_v40, %v292_v28  ;;  %v2134_v56 = vrot.slane %v521_v41, %v520_v31 }
  0x4c   :  { %1741 = vset.pattern.permute.xlu1 %v2594_v0  ;;  %v2136_v57 = vrot.slane %v129_v42, %v128_v32  ;;  %v2138_v58 = vrot.slane %v137_v43, %v128_v32  ;;  %v2140_v60 = vrot.slane %v529_v44, %v520_v31  ;;  %v2142_v61 = vrot.slane %v525_v45, %v520_v31 }
  0x4d   :  { %487 = vperm.xlu1 %1741, %v1969_v49   ;;  %v698_v49 = vsub.s32 3, %v127_v23  ;;  %v2147_v2 = vrot.slane %v533_v48, %v520_v31 }
  0x4f   :  { %1756 = vset.pattern.permute.xlu0 %v1765_v1 }
  0x50   :  { %121 = vperm.xlu0 %1756, %v2092_v21  }
  0x51   :  { %1742 = vset.pattern.permute.xlu1 %v1765_v1 }
  0x52   :  { %91 = vperm.xlu1 %1742, %v1991_v55  }
  0x56   :  { %1744 = vset.pattern.permute.xlu1 %v2594_v0 }
  0x57   :  { %491 = vperm.xlu1 %1744, %v1991_v55   ;;  %v682_v55 = vld [vmem:[%s2589_s2] sm:$0xf] }
  0x58   :  { %v2150_v3 = vrot.slane %v682_v55, %v292_v28  ;;  %v2152_v4 = vrot.slane %v682_v55, %v698_v49  ;;  %v2154_v5 = vrot.slane %v682_v55, %v128_v32  ;;  %v2168_v13 = vrot.slane %v682_v55, %v520_v31 }
  0x5b   :  { %1745 = vset.pattern.permute.xlu1 %v1766_v14 }
  0x5c   :  { %267 = vperm.xlu1 %1745, %v36_v11  }
  0x60   :  { %1746 = vset.pattern.permute.xlu1 %v2594_v0 }
  0x61   :  { %495 = vperm.xlu1 %1746, %v36_v11  }
  0x65   :  { %1747 = vset.pattern.permute.xlu1 %v1766_v14 }
  0x66   :  { %271 = vperm.xlu1 %1747, %v37_v18  }
  0x6a   :  { %1749 = vset.pattern.permute.xlu1 %v1765_v1 }
  0x6b   :  { %106 = vperm.xlu1 %1749, %v38_v19  }
  0x6f   :  { %1750 = vset.pattern.permute.xlu1 %v1766_v14 }
  0x70   :  { %275 = vperm.xlu1 %1750, %v38_v19  }
  0x74   :  { %1751 = vset.pattern.permute.xlu1 %v1765_v1 }
  0x75   :  { %111 = vperm.xlu1 %1751, %v39_v17  }
  0x79   :  { %1753 = vset.pattern.permute.xlu1 %v2594_v0 }
  0x7a   :  { %507 = vperm.xlu1 %1753, %v39_v17  }
  0x7d   :  { %v2107_v25 = vpop.permute.xlu1 %455  ;;  %v2109_v26 = vpop.permute.xlu0 %46 }
  0x7e   :  { %1754 = vset.pattern.permute.xlu1 %v1765_v1  ;;  %v162_v22 = vmul.f32 %v2136_v57, %v2109_v26  ;;  %v163_v23 = vmul.f32 %v2123_v50, %v2109_v26  ;;  %v164_v24 = vmul.f32 %v2138_v58, %v2109_v26  ;;  %v165_v32 = vmul.f32 %v2125_v51, %v2109_v26 }
  0x7f   :  { %116 = vperm.xlu1 %1754, %v40_v20   ;;  %v555_v34 = vmul.f32 %v2142_v61, %v2107_v25  ;;  %v557_v35 = vmul.f32 %v2147_v2, %v2107_v25 }
  0x82   :  { %v52_v38 = vpop.permute.xlu1 %51  ;;  %v460_v1 = vpop.permute.xlu0 %459 }
  0x83   :  { %1755 = vset.pattern.permute.xlu1 %v2594_v0  ;;  %v167_v6 = vmul.f32 %v2123_v50, %v52_v38  ;;  %v169_v7 = vmul.f32 %v2125_v51, %v52_v38  ;;  %v166_v11 = vmul.f32 %v2136_v57, %v52_v38  ;;  %v168_v12 = vmul.f32 %v2138_v58, %v52_v38 }
  0x84   :  { %511 = vperm.xlu1 %1755, %v40_v20   ;;  %v559_v15 = vmul.f32 %v2142_v61, %v460_v1  ;;  %v561_v16 = vmul.f32 %v2147_v2, %v460_v1  ;;  %v2174_v20 = vmul.f32 %v2140_v60, %v2107_v25  ;;  %v558_v27 = vmul.f32 %v2134_v56, %v460_v1 }
  0x85   :  { %v560_v28 = vmul.f32 %v2140_v60, %v460_v1 }
  0x86   :  { %v464_v54 = vpop.permute.xlu0 %463 }
  0x87   :  { %v232_v59 = vpop.permute.xlu1 %231  ;;  %v2191_v33 = vmul.f32 %v2134_v56, %v464_v54  ;;  %v563_v36 = vmul.f32 %v2142_v61, %v464_v54  ;;  %v564_v37 = vmul.f32 %v2140_v60, %v464_v54  ;;  %v565_v1 = vmul.f32 %v2147_v2, %v464_v54 }
  0x88   :  { %v331_v62 = vmul.f32 %v2119_v46, %v232_v59  ;;  %v333_v63 = vmul.f32 %v2121_v47, %v232_v59  ;;  %1757 = vset.pattern.permute.xlu1 %v1766_v14  ;;  %v330_v8 = vmul.f32 %v2127_v52, %v232_v59  ;;  %v332_v9 = vmul.f32 %v2129_v53, %v232_v59 }
  0x89   :  { %287 = vperm.xlu1 %1757, %v2092_v21   ;;  %v2164_v14 = vmul.f32 %v2134_v56, %v2107_v25 }
  0x8a   :  { %v2160_v10 = vpop.permute.xlu0 %479  ;;  %v395_v18 = vadd.f32 %v331_v62, %v167_v6  ;;  %v397_v19 = vadd.f32 %v333_v63, %v169_v7  ;;  %v394_v29 = vadd.f32 %v330_v8, %v166_v11  ;;  %v396_v30 = vadd.f32 %v332_v9, %v168_v12  ;;  %v2229_v7 = vld [vmem:[%s2590_s5 + $0x38] sm:$0xff] }
  0x8b   :  { %v2202_v26 = vmul.f32 %v2134_v56, %v2160_v10  ;;  %v2206_v39 = vmul.f32 %v2142_v61, %v2160_v10  ;;  %v2210_v40 = vmul.f32 %v2140_v60, %v2160_v10  ;;  %1664 = vmatprep.subr.mxu0 %v2229_v7  ;;  %1704 = vmatprep.subr.mxu1 %v2229_v7 }
  0x8c   :  { %v57_v17 = vpop.permute.xlu1 %56  ;;  %v623_v38 = vadd.f32 %v559_v15, %v395_v18  ;;  %v622_v43 = vadd.f32 %v558_v27, %v394_v29  ;;  %v624_v44 = vadd.f32 %v560_v28, %v396_v30 }
  0x8d   :  { %1758 = vset.pattern.permute.xlu1 %v2594_v0  ;;  %2597 = vst [vmem:[#allocation3_spill] sm:$0xff] %v2210_v40  ;;  %v170_v45 = vmul.f32 %v2136_v57, %v57_v17  ;;  %v171_v48 = vmul.f32 %v2123_v50, %v57_v17  ;;  %v172_v59 = vmul.f32 %v2138_v58, %v57_v17 }
  0x8e   :  { %515 = vperm.xlu1 %1758, %v2092_v21   ;;  %v2186_v31 = vpop.permute.xlu0 %483  ;;  %v625_v21 = vadd.f32 %v561_v16, %v397_v19  ;;  %v173_v62 = vmul.f32 %v2125_v51, %v57_v17  ;;  %v2221_v63 = vadd.f32 %v2150_v3, %v623_v38  ;;  %v2237_v19 = vadd.f32 %v2154_v5, %v622_v43 }
  0x8f   :  { %2596 = vst [vmem:[#allocation2_spill] sm:$0xff] %v2186_v31  ;;  %v2240_v17 = vadd.f32 %v2168_v13, %v624_v44 }
  0x90   :  { %v2224_v6 = vadd.f32 %v2152_v4, %v625_v21 }
  0x91   :  { %v236_v25 = vpop.permute.xlu1 %235 }
  0x92   :  { %v334_v41 = vmul.f32 %v2127_v52, %v236_v25  ;;  %v335_v42 = vmul.f32 %v2119_v46, %v236_v25  ;;  %v336_v49 = vmul.f32 %v2129_v53, %v236_v25  ;;  %v337_v54 = vmul.f32 %v2121_v47, %v236_v25 }
  0x93   :  { %v228_v55 = vpop.permute.xlu0 %227 }
  0x94   :  { %v326_v8 = vmul.f32 %v2127_v52, %v228_v55  ;;  %v327_v9 = vmul.f32 %v2119_v46, %v228_v55  ;;  %v328_v11 = vmul.f32 %v2129_v53, %v228_v55  ;;  %v329_v12 = vmul.f32 %v2121_v47, %v228_v55 }
  0x95   :  { %v398_v15 = vadd.f32 %v334_v41, %v170_v45  ;;  %v399_v16 = vadd.f32 %v335_v42, %v171_v48  ;;  %v400_v27 = vadd.f32 %v336_v49, %v172_v59  ;;  %v401_v28 = vadd.f32 %v337_v54, %v173_v62 }
  0x96   :  { %v62_v18 = vpop.permute.xlu1 %61  ;;  %v390_v29 = vadd.f32 %v326_v8, %v162_v22  ;;  %v392_v30 = vadd.f32 %v328_v11, %v164_v24  ;;  %v391_v45 = vadd.f32 %v327_v9, %v163_v23  ;;  %v393_v48 = vadd.f32 %v329_v12, %v165_v32 }
  0x97   :  { %v240_v38 = vpop.permute.xlu0 %239  ;;  %v174_v21 = vmul.f32 %v2136_v57, %v62_v18  ;;  %v175_v25 = vmul.f32 %v2123_v50, %v62_v18  ;;  %v176_v41 = vmul.f32 %v2138_v58, %v62_v18  ;;  %v177_v49 = vmul.f32 %v2125_v51, %v62_v18 }
  0x98   :  { %v338_v42 = vmul.f32 %v2127_v52, %v240_v38  ;;  %v339_v43 = vmul.f32 %v2119_v46, %v240_v38  ;;  %v340_v44 = vmul.f32 %v2129_v53, %v240_v38  ;;  %v341_v22 = vmul.f32 %v2121_v47, %v240_v38 }
  0x99   :  { %v618_v24 = vadd.f32 %v2164_v14, %v390_v29  ;;  %v620_v54 = vadd.f32 %v2174_v20, %v392_v30  ;;  %v619_v59 = vadd.f32 %v555_v34, %v391_v45  ;;  %v621_v62 = vadd.f32 %v557_v35, %v393_v48 }
  0x9a   :  { %v773_v11 = vmax.f32 %v2221_v63, 0.0  ;;  %v627_v0 = vadd.f32 %v563_v36, %v399_v16  ;;  %v2254_v31 = vadd.f32 %v338_v42, %v174_v21  ;;  %v629_v40 = vadd.f32 %v565_v1, %v401_v28 }
  0x9b   :  { %v468_v55 = vpop.permute.xlu1 %467  ;;  %v244_v8 = vpop.permute.xlu0 %243  ;;  %v626_v23 = vadd.f32 %v2191_v33, %v398_v15  ;;  %v628_v32 = vadd.f32 %v564_v37, %v400_v27  ;;  %v403_v9 = vadd.f32 %v339_v43, %v175_v25  ;;  %v404_v12 = vadd.f32 %v340_v44, %v176_v41 }
  0x9c   :  { %v705_v18 = vadd.f32 %v2150_v3, %v619_v59  ;;  %v707_v14 = vadd.f32 %v2152_v4, %v621_v62  ;;  %v405_v20 = vadd.f32 %v341_v22, %v177_v49  ;;  %v567_v34 = vmul.f32 %v2142_v61, %v468_v55 }
  0x9d   :  { %v704_v35 = vadd.f32 %v2154_v5, %v618_v24  ;;  %v706_v63 = vadd.f32 %v2168_v13, %v620_v54  ;;  %v342_v1 = vmul.f32 %v2127_v52, %v244_v8  ;;  %v343_v33 = vmul.f32 %v2119_v46, %v244_v8 }
  0x9e   :  { %v769_v36 = vmax.f32 %v705_v18, 0.0  ;;  %v771_v16 = vmax.f32 %v707_v14, 0.0  ;;  %v713_v29 = vadd.f32 %v2150_v3, %v627_v0  ;;  %v715_v30 = vadd.f32 %v2152_v4, %v629_v40 }
  0x9f   :  { %v2264_v37 = vpop.permute.xlu0 %259  ;;  %v768_v15 = vmax.f32 %v704_v35, 0.0  ;;  %v770_v27 = vmax.f32 %v706_v63, 0.0  ;;  %v345_v38 = vmul.f32 %v2121_v47, %v244_v8  ;;  %v775_v41 = vmax.f32 %v2224_v6, 0.0 }
  0xa0   :  { %v67_v28 = vpop.permute.xlu1 %66  ;;  %967 = vmatprep.mubr.f32.mxu0 %v769_v36  ;;  %1112 = vmatprep.mubr.f32.mxu1 %v771_v16  ;;  %v566_v42 = vmul.f32 %v2134_v56, %v468_v55  ;;  %v568_v43 = vmul.f32 %v2140_v60, %v468_v55  ;;  %v772_v40 = vmax.f32 %v2237_v19, 0.0  ;;  %v569_v44 = vmul.f32 %v2147_v2, %v468_v55 }
  0xa1   :  { %v178_v21 = vmul.f32 %v2136_v57, %v67_v28  ;;  %v179_v25 = vmul.f32 %v2123_v50, %v67_v28  ;;  %968 = vmatmul.mubr.f32.vlgmr.msra.gmra.mxu0 %v768_v15  ;;  %1113 = vmatmul.mubr.f32.vlgmr.msra.gmra.mxu1 %v770_v27  ;;  %v181_v0 = vmul.f32 %v2125_v51, %v67_v28  ;;  %v774_v6 = vmax.f32 %v2240_v17, 0.0 }
  0xa2   :  { %v344_v45 = vmul.f32 %v2129_v53, %v244_v8  ;;  %v180_v48 = vmul.f32 %v2138_v58, %v67_v28  ;;  %972 = vmatprep.mubr.f32.mxu0 %v773_v11  ;;  %1117 = vmatprep.mubr.f32.mxu1 %v775_v41  ;;  %v777_v54 = vmax.f32 %v713_v29, 0.0  ;;  %v779_v59 = vmax.f32 %v715_v30, 0.0 }
  0xa3   :  { %v2280_v49 = vpop.permute.xlu0 %263  ;;  %v406_v22 = vadd.f32 %v342_v1, %v178_v21  ;;  %v407_v24 = vadd.f32 %v343_v33, %v179_v25  ;;  %1665 = vmatpush3.msra.mxu0 %v2229_v7  ;;  %v409_v62 = vadd.f32 %v345_v38, %v181_v0  ;;  %v712_v55 = vadd.f32 %v2154_v5, %v626_v23 }
  0xa4   :  { %v714_v8 = vadd.f32 %v2168_v13, %v628_v32  ;;  %v631_v18 = vadd.f32 %v567_v34, %v403_v9  ;;  %1712 = vmatpush3.msra.mxu1 %v2229_v7  ;;  %v633_v32 = vadd.f32 %v569_v44, %v405_v20  ;;  %v630_v7 = vadd.f32 %v566_v42, %v2254_v31 }
  0xa5   :  { %v472_v19 = vpop.permute.xlu1 %471  ;;  %973 = vmatmul.mubr.f32.gmra.mxu0 %v772_v40  ;;  %1118 = vmatmul.mubr.f32.gmra.mxu1 %v774_v6  ;;  %v776_v63 = vmax.f32 %v712_v55, 0.0  ;;  %v632_v34 = vadd.f32 %v568_v43, %v404_v12  ;;  %v408_v40 = vadd.f32 %v344_v45, %v180_v48 }
  0xa6   :  { %v570_v17 = vmul.f32 %v2134_v56, %v472_v19  ;;  %v571_v11 = vmul.f32 %v2142_v61, %v472_v19  ;;  %v572_v14 = vmul.f32 %v2140_v60, %v472_v19  ;;  %977 = vmatprep.mubr.f32.mxu0 %v777_v54  ;;  %1122 = vmatprep.mubr.f32.mxu1 %v779_v59  ;;  %v778_v36 = vmax.f32 %v714_v8, 0.0 }
  0xa7   :  { %v573_v35 = vmul.f32 %v2147_v2, %v472_v19  ;;  %v717_v23 = vadd.f32 %v2150_v3, %v631_v18  ;;  %v719_v28 = vadd.f32 %v2152_v4, %v633_v32  ;;  %v716_v20 = vadd.f32 %v2154_v5, %v630_v7 }
  0xa8   :  { %v72_v9 = vpop.permute.xlu0 %71  ;;  %v635_v16 = vadd.f32 %v571_v11, %v407_v24  ;;  %v718_v42 = vadd.f32 %v2168_v13, %v632_v34  ;;  %v634_v55 = vadd.f32 %v570_v17, %v406_v22  ;;  %v636_v11 = vadd.f32 %v572_v14, %v408_v40 }
  0xa9   :  { %v781_v1 = vmax.f32 %v717_v23, 0.0  ;;  %v182_v33 = vmul.f32 %v2136_v57, %v72_v9  ;;  %v183_v15 = vmul.f32 %v2123_v50, %v72_v9  ;;  %v184_v27 = vmul.f32 %v2138_v58, %v72_v9  ;;  %978 = vmatmul.mubr.f32.gmra.mxu0 %v776_v63  ;;  %1123 = vmatmul.mubr.f32.gmra.mxu1 %v778_v36 }
  0xaa   :  { %v248_v29 = vpop.permute.xlu1 %247  ;;  %v185_v30 = vmul.f32 %v2125_v51, %v72_v9  ;;  %v783_v25 = vmax.f32 %v719_v28, 0.0  ;;  %v780_v41 = vmax.f32 %v716_v20, 0.0  ;;  %v721_v43 = vadd.f32 %v2150_v3, %v635_v16 }
  0xab   :  { %982 = vmatprep.mubr.f32.mxu0 %v781_v1  ;;  %v346_v31 = vmul.f32 %v2127_v52, %v248_v29  ;;  %v347_v12 = vmul.f32 %v2119_v46, %v248_v29  ;;  %v348_v38 = vmul.f32 %v2129_v53, %v248_v29  ;;  %v349_v21 = vmul.f32 %v2121_v47, %v248_v29 }
  0xac   :  { %v77_v0 = vpop.permute.xlu0 %76  ;;  %1127 = vmatprep.mubr.f32.mxu1 %v783_v25  ;;  %v782_v54 = vmax.f32 %v718_v42, 0.0  ;;  %v785_v59 = vmax.f32 %v721_v43, 0.0  ;;  %v637_v19 = vadd.f32 %v573_v35, %v409_v62  ;;  %v720_v22 = vadd.f32 %v2154_v5, %v634_v55 }
  0xad   :  { %v410_v44 = vadd.f32 %v346_v31, %v182_v33  ;;  %v411_v6 = vadd.f32 %v347_v12, %v183_v15  ;;  %v412_v24 = vadd.f32 %v348_v38, %v184_v27  ;;  %983 = vmatmul.mubr.f32.gmra.mxu0 %v780_v41  ;;  %v413_v8 = vadd.f32 %v349_v21, %v185_v30 }
  0xae   :  { %v186_v63 = vmul.f32 %v2136_v57, %v77_v0  ;;  %v187_v36 = vmul.f32 %v2123_v50, %v77_v0  ;;  %1128 = vmatmul.mubr.f32.gmra.mxu1 %v782_v54  ;;  %987 = vmatprep.mubr.f32.mxu0 %v785_v59  ;;  %v723_v45 = vadd.f32 %v2152_v4, %v637_v19  ;;  %v784_v34 = vmax.f32 %v720_v22, 0.0  ;;  %v2598_v19 = vld [vmem:[#allocation3_spill] sm:$0xff] }
  0xaf   :  { %v476_v18 = vpop.permute.xlu1 %475  ;;  %v722_v17 = vadd.f32 %v2168_v13, %v636_v11  ;;  %v188_v35 = vmul.f32 %v2138_v58, %v77_v0  ;;  %v581_v15 = vmul.f32 %v2147_v2, %v2160_v10  ;;  %v189_v28 = vmul.f32 %v2125_v51, %v77_v0 }
  0xb0   :  { %v574_v48 = vmul.f32 %v2134_v56, %v476_v18  ;;  %v575_v23 = vmul.f32 %v2142_v61, %v476_v18  ;;  %v576_v32 = vmul.f32 %v2140_v60, %v476_v18  ;;  %v577_v62 = vmul.f32 %v2147_v2, %v476_v18 }
  0xb1   :  { %v787_v14 = vmax.f32 %v723_v45, 0.0  ;;  %v786_v16 = vmax.f32 %v722_v17, 0.0  ;;  %988 = vmatmul.mubr.f32.gmra.mxu0 %v784_v34 }
  0xb2   :  { %v639_v9 = vadd.f32 %v575_v23, %v411_v6  ;;  %v638_v7 = vadd.f32 %v574_v48, %v410_v44  ;;  %v641_v1 = vadd.f32 %v577_v62, %v413_v8  ;;  %v640_v33 = vadd.f32 %v576_v32, %v412_v24 }
  0xb3   :  { %1132 = vmatprep.mubr.f32.mxu1 %v787_v14 }
  0xb4   :  { %v252_v27 = vpop.permute.xlu1 %251  ;;  %v725_v29 = vadd.f32 %v2150_v3, %v639_v9  ;;  %v724_v30 = vadd.f32 %v2154_v5, %v638_v7  ;;  %1133 = vmatmul.mubr.f32.gmra.mxu1 %v786_v16  ;;  %v727_v10 = vadd.f32 %v2152_v4, %v641_v1  ;;  %v726_v0 = vadd.f32 %v2168_v13, %v640_v33 }
  0xb5   :  { %v350_v20 = vmul.f32 %v2127_v52, %v252_v27  ;;  %v351_v31 = vmul.f32 %v2119_v46, %v252_v27  ;;  %v352_v12 = vmul.f32 %v2129_v53, %v252_v27  ;;  %v353_v38 = vmul.f32 %v2121_v47, %v252_v27 }
  0xb6   :  { %v789_v21 = vmax.f32 %v725_v29, 0.0  ;;  %v788_v25 = vmax.f32 %v724_v30, 0.0  ;;  %v791_v44 = vmax.f32 %v727_v10, 0.0  ;;  %v790_v24 = vmax.f32 %v726_v0, 0.0 }
  0xb7   :  { %v414_v41 = vadd.f32 %v350_v20, %v186_v63  ;;  %v415_v42 = vadd.f32 %v351_v31, %v187_v36  ;;  %v416_v43 = vadd.f32 %v352_v12, %v188_v35  ;;  %v417_v40 = vadd.f32 %v353_v38, %v189_v28  ;;  %v2599_v36 = vld [vmem:[#allocation2_spill] sm:$0xff] }
  0xb8   :  { %992 = vmatprep.mubr.f32.mxu0 %v789_v21  ;;  %1137 = vmatprep.mubr.f32.mxu1 %v791_v44  ;;  %v582_v45 = vmul.f32 %v2134_v56, %v2599_v36  ;;  %v583_v16 = vmul.f32 %v2142_v61, %v2599_v36  ;;  %v584_v1 = vmul.f32 %v2140_v60, %v2599_v36 }
  0xb9   :  { %v82_v6 = vpop.permute.xlu1 %81  ;;  %993 = vmatmul.mubr.f32.gmra.mxu0 %v788_v25  ;;  %v643_v54 = vadd.f32 %v2206_v39, %v415_v42  ;;  %v642_v59 = vadd.f32 %v2202_v26, %v414_v41  ;;  %v644_v55 = vadd.f32 %v2598_v19, %v416_v43  ;;  %1138 = vmatmul.mubr.f32.gmra.mxu1 %v790_v24 }
  0xba   :  { %v645_v18 = vadd.f32 %v581_v15, %v417_v40  ;;  %v190_v48 = vmul.f32 %v2136_v57, %v82_v6  ;;  %v191_v32 = vmul.f32 %v2123_v50, %v82_v6  ;;  %v192_v62 = vmul.f32 %v2138_v58, %v82_v6 }
  0xbb   :  { %v729_v8 = vadd.f32 %v2150_v3, %v643_v54  ;;  %v728_v11 = vadd.f32 %v2154_v5, %v642_v59  ;;  %v730_v63 = vadd.f32 %v2168_v13, %v644_v55  ;;  %v193_v22 = vmul.f32 %v2125_v51, %v82_v6 }
  0xbc   :  { %v731_v39 = vadd.f32 %v2152_v4, %v645_v18  ;;  %v585_v33 = vmul.f32 %v2147_v2, %v2599_v36  ;;  %v358_v20 = vmul.f32 %v2127_v52, %v2264_v37  ;;  %v359_v31 = vmul.f32 %v2119_v46, %v2264_v37 }
  0xbd   :  { %v793_v23 = vmax.f32 %v729_v8, 0.0  ;;  %v792_v26 = vmax.f32 %v728_v11, 0.0  ;;  %v794_v14 = vmax.f32 %v730_v63, 0.0  ;;  %v360_v12 = vmul.f32 %v2129_v53, %v2264_v37 }
  0xbe   :  { %v256_v17 = vpop.permute.xlu1 %255  ;;  %v795_v15 = vmax.f32 %v731_v39, 0.0  ;;  %v361_v38 = vmul.f32 %v2121_v47, %v2264_v37 }
  0xbf   :  { %v354_v35 = vmul.f32 %v2127_v52, %v256_v17  ;;  %v355_v9 = vmul.f32 %v2119_v46, %v256_v17  ;;  %v356_v7 = vmul.f32 %v2129_v53, %v256_v17  ;;  %v357_v34 = vmul.f32 %v2121_v47, %v256_v17  ;;  %997 = vmatprep.mubr.f32.mxu0 %v793_v23 }
  0xc0   :  { %998 = vmatmul.mubr.f32.gmra.mxu0 %v792_v26  ;;  %1142 = vmatprep.mubr.f32.mxu1 %v795_v15 }
  0xc1   :  { %v418_v27 = vadd.f32 %v354_v35, %v190_v48  ;;  %v419_v28 = vadd.f32 %v355_v9, %v191_v32  ;;  %v420_v29 = vadd.f32 %v356_v7, %v192_v62  ;;  %v421_v30 = vadd.f32 %v357_v34, %v193_v22  ;;  %1143 = vmatmul.mubr.f32.gmra.mxu1 %v794_v14 }
  0xc2   :  { %v362_v14 = vmul.f32 %v2127_v52, %v2280_v49 }
  0xc3   :  { %v87_v21 = vpop.permute.xlu1 %86  ;;  %v647_v10 = vadd.f32 %v583_v16, %v419_v28  ;;  %v649_v25 = vadd.f32 %v585_v33, %v421_v30  ;;  %v646_v41 = vadd.f32 %v582_v45, %v418_v27  ;;  %v648_v42 = vadd.f32 %v584_v1, %v420_v29 }
  0xc4   :  { %v194_v43 = vmul.f32 %v2136_v57, %v87_v21  ;;  %v195_v0 = vmul.f32 %v2123_v50, %v87_v21  ;;  %v196_v40 = vmul.f32 %v2138_v58, %v87_v21  ;;  %v197_v44 = vmul.f32 %v2125_v51, %v87_v21 }
  0xc5   :  { %v733_v6 = vadd.f32 %v2150_v3, %v647_v10  ;;  %v735_v24 = vadd.f32 %v2152_v4, %v649_v25  ;;  %v732_v37 = vadd.f32 %v2154_v5, %v646_v41  ;;  %v734_v54 = vadd.f32 %v2168_v13, %v648_v42 }
  0xc6   :  { %v422_v18 = vadd.f32 %v358_v20, %v194_v43  ;;  %v423_v11 = vadd.f32 %v359_v31, %v195_v0  ;;  %v424_v63 = vadd.f32 %v360_v12, %v196_v40  ;;  %v425_v36 = vadd.f32 %v361_v38, %v197_v44 }
  0xc7   :  { %v797_v59 = vmax.f32 %v733_v6, 0.0  ;;  %v799_v19 = vmax.f32 %v735_v24, 0.0  ;;  %v796_v55 = vmax.f32 %v732_v37, 0.0  ;;  %v798_v8 = vmax.f32 %v734_v54, 0.0  ;;  %v97_v6 = vpop.permute.xlu0 %96 }
  0xc8   :  { %v488_v45 = vpop.permute.xlu1 %487  ;;  %v363_v31 = vmul.f32 %v2119_v46, %v2280_v49  ;;  %v364_v12 = vmul.f32 %v2129_v53, %v2280_v49  ;;  %v365_v38 = vmul.f32 %v2121_v47, %v2280_v49 }
  0xc9   :  { %v586_v48 = vmul.f32 %v2134_v56, %v488_v45  ;;  %v587_v23 = vmul.f32 %v2142_v61, %v488_v45  ;;  %v588_v39 = vmul.f32 %v2140_v60, %v488_v45  ;;  %v589_v26 = vmul.f32 %v2147_v2, %v488_v45  ;;  %1002 = vmatprep.mubr.f32.mxu0 %v797_v59 }
  0xca   :  { %1147 = vmatprep.mubr.f32.mxu1 %v799_v19  ;;  %1003 = vmatmul.mubr.f32.gmra.mxu0 %v796_v55  ;;  %v202_v59 = vmul.f32 %v2136_v57, %v97_v6  ;;  %v203_v19 = vmul.f32 %v2123_v50, %v97_v6  ;;  %v204_v55 = vmul.f32 %v2138_v58, %v97_v6 }
  0xcb   :  { %1148 = vmatmul.mubr.f32.gmra.mxu1 %v798_v8  ;;  %v651_v32 = vadd.f32 %v587_v23, %v423_v11  ;;  %v653_v62 = vadd.f32 %v589_v26, %v425_v36  ;;  %v650_v22 = vadd.f32 %v586_v48, %v422_v18  ;;  %v652_v17 = vadd.f32 %v588_v39, %v424_v63  ;;  %v102_v48 = vpop.permute.xlu0 %101 }
  0xcc   :  { %v205_v8 = vmul.f32 %v2125_v51, %v97_v6 }
  0xcd   :  { %v92_v35 = vpop.permute.xlu1 %91  ;;  %v737_v9 = vadd.f32 %v2150_v3, %v651_v32  ;;  %v739_v7 = vadd.f32 %v2152_v4, %v653_v62  ;;  %v736_v34 = vadd.f32 %v2154_v5, %v650_v22  ;;  %v738_v16 = vadd.f32 %v2168_v13, %v652_v17 }
  0xce   :  { %v198_v1 = vmul.f32 %v2136_v57, %v92_v35  ;;  %v199_v33 = vmul.f32 %v2123_v50, %v92_v35  ;;  %v200_v15 = vmul.f32 %v2138_v58, %v92_v35  ;;  %v201_v27 = vmul.f32 %v2125_v51, %v92_v35 }
  0xcf   :  { %v801_v28 = vmax.f32 %v737_v9, 0.0  ;;  %v803_v29 = vmax.f32 %v739_v7, 0.0  ;;  %v800_v30 = vmax.f32 %v736_v34, 0.0  ;;  %v802_v20 = vmax.f32 %v738_v16, 0.0 }
  0xd0   :  { %v426_v21 = vadd.f32 %v362_v14, %v198_v1  ;;  %v427_v10 = vadd.f32 %v363_v31, %v199_v33  ;;  %v428_v25 = vadd.f32 %v364_v12, %v200_v15  ;;  %v429_v41 = vadd.f32 %v365_v38, %v201_v27 }
  0xd1   :  { %1007 = vmatprep.mubr.f32.mxu0 %v801_v28  ;;  %1152 = vmatprep.mubr.f32.mxu1 %v803_v29  ;;  %v500_v28 = vpop.permute.xlu0 %499  ;;  %v206_v29 = vmul.f32 %v2136_v57, %v102_v48  ;;  %v209_v31 = vmul.f32 %v2125_v51, %v102_v48 }
  0xd2   :  { %v492_v42 = vpop.permute.xlu1 %491  ;;  %1008 = vmatmul.mubr.f32.gmra.mxu0 %v800_v30  ;;  %1153 = vmatmul.mubr.f32.gmra.mxu1 %v802_v20  ;;  %v207_v30 = vmul.f32 %v2123_v50, %v102_v48  ;;  %v208_v20 = vmul.f32 %v2138_v58, %v102_v48 }
  0xd3   :  { %v590_v43 = vmul.f32 %v2134_v56, %v492_v42  ;;  %v591_v0 = vmul.f32 %v2142_v61, %v492_v42  ;;  %v592_v40 = vmul.f32 %v2140_v60, %v492_v42  ;;  %v593_v44 = vmul.f32 %v2147_v2, %v492_v42 }
  0xd4   :  { %v600_v42 = vmul.f32 %v2140_v60, %v500_v28 }
  0xd5   :  { %v655_v24 = vadd.f32 %v591_v0, %v427_v10  ;;  %v657_v49 = vadd.f32 %v593_v44, %v429_v41  ;;  %v654_v37 = vadd.f32 %v590_v43, %v426_v21  ;;  %v656_v54 = vadd.f32 %v592_v40, %v428_v25 }
  0xd6   :  { %v598_v25 = vmul.f32 %v2134_v56, %v500_v28  ;;  %v599_v41 = vmul.f32 %v2142_v61, %v500_v28  ;;  %v601_v43 = vmul.f32 %v2147_v2, %v500_v28 }
  0xd7   :  { %v268_v18 = vpop.permute.xlu1 %267  ;;  %v741_v11 = vadd.f32 %v2150_v3, %v655_v24  ;;  %v743_v63 = vadd.f32 %v2152_v4, %v657_v49  ;;  %v740_v36 = vadd.f32 %v2154_v5, %v654_v37  ;;  %v742_v45 = vadd.f32 %v2168_v13, %v656_v54 }
  0xd8   :  { %v366_v23 = vmul.f32 %v2127_v52, %v268_v18  ;;  %v367_v39 = vmul.f32 %v2119_v46, %v268_v18  ;;  %v368_v26 = vmul.f32 %v2129_v53, %v268_v18  ;;  %v369_v32 = vmul.f32 %v2121_v47, %v268_v18 }
  0xd9   :  { %v805_v62 = vmax.f32 %v741_v11, 0.0  ;;  %v807_v22 = vmax.f32 %v743_v63, 0.0  ;;  %v804_v17 = vmax.f32 %v740_v36, 0.0  ;;  %v806_v14 = vmax.f32 %v742_v45, 0.0 }
  0xda   :  { %v430_v35 = vadd.f32 %v366_v23, %v202_v59  ;;  %v431_v9 = vadd.f32 %v367_v39, %v203_v19  ;;  %v432_v7 = vadd.f32 %v368_v26, %v204_v55  ;;  %v433_v34 = vadd.f32 %v369_v32, %v205_v8  ;;  %v1215_v19 = vld [vmem:[%s2590_s5 + $0x30] sm:$0xff]  ;;  %v504_v23 = vpop.permute.xlu0 %503 }
  0xdb   :  { %1012 = vmatprep.mubr.f32.mxu0 %v805_v62  ;;  %1157 = vmatprep.mubr.f32.mxu1 %v807_v22 }
  0xdc   :  { %v496_v16 = vpop.permute.xlu1 %495  ;;  %1013 = vmatmul.mubr.f32.gmra.mxu0 %v804_v17  ;;  %1158 = vmatmul.mubr.f32.gmra.mxu1 %v806_v14 }
  0xdd   :  { %v594_v1 = vmul.f32 %v2134_v56, %v496_v16  ;;  %v595_v33 = vmul.f32 %v2142_v61, %v496_v16  ;;  %v596_v15 = vmul.f32 %v2140_v60, %v496_v16  ;;  %v597_v27 = vmul.f32 %v2147_v2, %v496_v16  ;;  %1666 = vmatprep.subr.mxu0 %v1215_v19 }
  0xde   :  { %1705 = vmatprep.subr.mxu1 %v1215_v19  ;;  %1667 = vmatpush3.msra.mxu0 %v1215_v19  ;;  %v605_v16 = vmul.f32 %v2147_v2, %v504_v23  ;;  %v280_v28 = vpop.permute.xlu0 %279 }
  0xdf   :  { %v659_v12 = vadd.f32 %v595_v33, %v431_v9  ;;  %v661_v38 = vadd.f32 %v597_v27, %v433_v34  ;;  %v658_v21 = vadd.f32 %v594_v1, %v430_v35  ;;  %v660_v10 = vadd.f32 %v596_v15, %v432_v7  ;;  %1713 = vmatpush3.msra.mxu1 %v1215_v19 }
  0xe0   :  { %v602_v9 = vmul.f32 %v2134_v56, %v504_v23  ;;  %v603_v7 = vmul.f32 %v2142_v61, %v504_v23  ;;  %v604_v34 = vmul.f32 %v2140_v60, %v504_v23  ;;  %v2465_v23 = vld [vmem:[%s2590_s5 + $0x10] sm:$0xff] }
  0xe1   :  { %v272_v0 = vpop.permute.xlu1 %271  ;;  %v745_v40 = vadd.f32 %v2150_v3, %v659_v12  ;;  %v747_v44 = vadd.f32 %v2152_v4, %v661_v38  ;;  %v744_v6 = vadd.f32 %v2154_v5, %v658_v21  ;;  %v746_v24 = vadd.f32 %v2168_v13, %v660_v10  ;;  %v1214_v38 = vld [vmem:[%s2590_s5 + $0x28] sm:$0xff] }
  0xe2   :  { %v370_v49 = vmul.f32 %v2127_v52, %v272_v0  ;;  %v371_v37 = vmul.f32 %v2119_v46, %v272_v0  ;;  %v372_v54 = vmul.f32 %v2129_v53, %v272_v0  ;;  %v373_v59 = vmul.f32 %v2121_v47, %v272_v0  ;;  %v2446_v0 = vld [vmem:[%s2590_s5 + $0x20] sm:$0xff]  ;;  %1668 = vmatprep.subr.mxu0 %v1214_v38 }
  0xe3   :  { %v809_v55 = vmax.f32 %v745_v40, 0.0  ;;  %v811_v8 = vmax.f32 %v747_v44, 0.0  ;;  %v808_v18 = vmax.f32 %v744_v6, 0.0  ;;  %v810_v11 = vmax.f32 %v746_v24, 0.0  ;;  %1669 = vmatpush3.msra.mxu0 %v1214_v38  ;;  %1706 = vmatprep.subr.mxu1 %v1214_v38 }
  0xe4   :  { %v434_v63 = vadd.f32 %v370_v49, %v206_v29  ;;  %v435_v36 = vadd.f32 %v371_v37, %v207_v30  ;;  %v436_v45 = vadd.f32 %v372_v54, %v208_v20  ;;  %v437_v48 = vadd.f32 %v373_v59, %v209_v31  ;;  %v2454_v59 = vld [vmem:[%s2590_s5 + $0x18] sm:$0xff]  ;;  %1670 = vmatprep.subr.mxu0 %v2446_v0 }
  0xe5   :  { %1017 = vmatprep.mubr.f32.mxu0 %v809_v55  ;;  %1162 = vmatprep.mubr.f32.mxu1 %v811_v8  ;;  %v379_v49 = vmul.f32 %v2119_v46, %v280_v28  ;;  %v380_v37 = vmul.f32 %v2129_v53, %v280_v28  ;;  %v381_v54 = vmul.f32 %v2121_v47, %v280_v28 }
  0xe6   :  { %v107_v39 = vpop.permute.xlu1 %106  ;;  %1018 = vmatmul.mubr.f32.gmra.mxu0 %v808_v18  ;;  %1163 = vmatmul.mubr.f32.gmra.mxu1 %v810_v11  ;;  %v663_v26 = vadd.f32 %v599_v41, %v435_v36  ;;  %v665_v32 = vadd.f32 %v601_v43, %v437_v48  ;;  %v662_v62 = vadd.f32 %v598_v25, %v434_v63 }
  0xe7   :  { %v664_v35 = vadd.f32 %v600_v42, %v436_v45  ;;  %v210_v29 = vmul.f32 %v2136_v57, %v107_v39  ;;  %v211_v30 = vmul.f32 %v2123_v50, %v107_v39  ;;  %v212_v20 = vmul.f32 %v2138_v58, %v107_v39  ;;  %1671 = vmatpush3.msra.mxu0 %v2446_v0 }
  0xe8   :  { %v749_v22 = vadd.f32 %v2150_v3, %v663_v26  ;;  %v751_v17 = vadd.f32 %v2152_v4, %v665_v32  ;;  %v748_v14 = vadd.f32 %v2154_v5, %v662_v62  ;;  %v213_v31 = vmul.f32 %v2125_v51, %v107_v39  ;;  %1672 = vmatprep.subr.mxu0 %v2454_v59 }
  0xe9   :  { %v750_v27 = vadd.f32 %v2168_v13, %v664_v35  ;;  %v378_v43 = vmul.f32 %v2127_v52, %v280_v28  ;;  %1673 = vmatpush3.msra.mxu0 %v2454_v59  ;;  %1714 = vmatpush3.msra.mxu1 %v1214_v38 }
  0xea   :  { %v813_v1 = vmax.f32 %v749_v22, 0.0  ;;  %v815_v33 = vmax.f32 %v751_v17, 0.0  ;;  %v812_v15 = vmax.f32 %v748_v14, 0.0  ;;  %1674 = vmatprep.subr.mxu0 %v2465_v23  ;;  %1707 = vmatprep.subr.mxu1 %v2446_v0 }
  0xeb   :  { %v276_v12 = vpop.permute.xlu1 %275  ;;  %v814_v42 = vmax.f32 %v750_v27, 0.0  ;;  %1675 = vmatpush3.msra.mxu0 %v2465_v23  ;;  %1715 = vmatpush3.msra.mxu1 %v2446_v0 }
  0xec   :  { %v374_v21 = vmul.f32 %v2127_v52, %v276_v12  ;;  %v375_v10 = vmul.f32 %v2119_v46, %v276_v12  ;;  %v376_v25 = vmul.f32 %v2129_v53, %v276_v12  ;;  %v377_v41 = vmul.f32 %v2121_v47, %v276_v12  ;;  %1022 = vmatprep.mubr.f32.mxu0 %v813_v1 }
  0xed   :  { %1167 = vmatprep.mubr.f32.mxu1 %v815_v33  ;;  %1023 = vmatmul.mubr.f32.gmra.mxu0 %v812_v15 }
  0xee   :  { %v438_v40 = vadd.f32 %v374_v21, %v210_v29  ;;  %v439_v44 = vadd.f32 %v375_v10, %v211_v30  ;;  %v440_v6 = vadd.f32 %v376_v25, %v212_v20  ;;  %v441_v24 = vadd.f32 %v377_v41, %v213_v31  ;;  %1168 = vmatmul.mubr.f32.gmra.mxu1 %v814_v42  ;;  %v2482_v30 = vld [vmem:[%s2590_s5 + $0x8] sm:$0xff]  ;;  %v2488_v10 = vld [vmem:[%s2590_s5] sm:$0xff] }
  0xef   :  { %1676 = vmatprep.subr.mxu0 %v2482_v30  ;;  %1708 = vmatprep.subr.mxu1 %v2454_v59 }
  0xf0   :  { %v112_v19 = vpop.permute.xlu1 %111  ;;  %v667_v55 = vadd.f32 %v603_v7, %v439_v44  ;;  %v669_v8 = vadd.f32 %v605_v16, %v441_v24  ;;  %v666_v18 = vadd.f32 %v602_v9, %v438_v40  ;;  %v668_v11 = vadd.f32 %v604_v34, %v440_v6  ;;  %v284_v7 = vpop.permute.xlu0 %283  ;;  %1677 = vmatpush3.msra.mxu0 %v2482_v30 }
  0xf1   :  { %v214_v63 = vmul.f32 %v2136_v57, %v112_v19  ;;  %v215_v36 = vmul.f32 %v2123_v50, %v112_v19  ;;  %v216_v45 = vmul.f32 %v2138_v58, %v112_v19  ;;  %v217_v48 = vmul.f32 %v2125_v51, %v112_v19  ;;  %1678 = vmatprep.subr.mxu0 %v2488_v10 }
  0xf2   :  { %v753_v39 = vadd.f32 %v2150_v3, %v667_v55  ;;  %v755_v26 = vadd.f32 %v2152_v4, %v669_v8  ;;  %v752_v32 = vadd.f32 %v2154_v5, %v666_v18  ;;  %v754_v62 = vadd.f32 %v2168_v13, %v668_v11  ;;  %1679 = vmatpush3.msra.mxu0 %v2488_v10 }
  0xf3   :  { %v442_v22 = vadd.f32 %v378_v43, %v214_v63  ;;  %v443_v34 = vadd.f32 %v379_v49, %v215_v36  ;;  %v444_v16 = vadd.f32 %v380_v37, %v216_v45  ;;  %v445_v1 = vadd.f32 %v381_v54, %v217_v48  ;;  %1716 = vmatpush3.msra.mxu1 %v2454_v59 }
  0xf4   :  { %v817_v17 = vmax.f32 %v753_v39, 0.0  ;;  %v819_v14 = vmax.f32 %v755_v26, 0.0  ;;  %v816_v35 = vmax.f32 %v752_v32, 0.0  ;;  %v818_v9 = vmax.f32 %v754_v62, 0.0  ;;  %v122_v0 = vpop.permute.xlu0 %121  ;;  %1709 = vmatprep.subr.mxu1 %v2465_v23 }
  0xf5   :  { %v508_v33 = vpop.permute.xlu1 %507  ;;  %v382_v20 = vmul.f32 %v2127_v52, %v284_v7  ;;  %v383_v25 = vmul.f32 %v2119_v46, %v284_v7  ;;  %v384_v41 = vmul.f32 %v2129_v53, %v284_v7  ;;  %v385_v42 = vmul.f32 %v2121_v47, %v284_v7  ;;  %1717 = vmatpush3.msra.mxu1 %v2465_v23 }
  0xf6   :  { %v606_v15 = vmul.f32 %v2134_v56, %v508_v33  ;;  %v607_v27 = vmul.f32 %v2142_v61, %v508_v33  ;;  %v608_v28 = vmul.f32 %v2140_v60, %v508_v33  ;;  %v609_v29 = vmul.f32 %v2147_v2, %v508_v33  ;;  %1027 = vmatprep.mubr.f32.mxu0 %v817_v17 }
  0xf7   :  { %1172 = vmatprep.mubr.f32.mxu1 %v819_v14  ;;  %1028 = vmatmul.mubr.f32.gmra.mxu0 %v816_v35  ;;  %v222_v7 = vmul.f32 %v2136_v57, %v122_v0 }
  0xf8   :  { %1173 = vmatmul.mubr.f32.gmra.mxu1 %v818_v9  ;;  %v671_v31 = vadd.f32 %v607_v27, %v443_v34  ;;  %v673_v12 = vadd.f32 %v609_v29, %v445_v1  ;;  %v670_v38 = vadd.f32 %v606_v15, %v442_v22  ;;  %v672_v21 = vadd.f32 %v608_v28, %v444_v16 }
  0xf9   :  { %v223_v34 = vmul.f32 %v2123_v50, %v122_v0  ;;  %v224_v16 = vmul.f32 %v2138_v58, %v122_v0  ;;  %v225_v1 = vmul.f32 %v2125_v51, %v122_v0  ;;  %1710 = vmatprep.subr.mxu1 %v2482_v30 }
  0xfa   :  { %v117_v43 = vpop.permute.xlu1 %116  ;;  %v757_v40 = vadd.f32 %v2150_v3, %v671_v31  ;;  %v759_v44 = vadd.f32 %v2152_v4, %v673_v12  ;;  %v756_v6 = vadd.f32 %v2154_v5, %v670_v38  ;;  %v758_v24 = vadd.f32 %v2168_v13, %v672_v21  ;;  %1718 = vmatpush3.msra.mxu1 %v2482_v30 }
  0xfb   :  { %v218_v49 = vmul.f32 %v2136_v57, %v117_v43  ;;  %v219_v37 = vmul.f32 %v2123_v50, %v117_v43  ;;  %v220_v54 = vmul.f32 %v2138_v58, %v117_v43  ;;  %v221_v19 = vmul.f32 %v2125_v51, %v117_v43  ;;  %1711 = vmatprep.subr.mxu1 %v2488_v10 }
  0xfc   :  { %v821_v55 = vmax.f32 %v757_v40, 0.0  ;;  %v823_v8 = vmax.f32 %v759_v44, 0.0  ;;  %v820_v18 = vmax.f32 %v756_v6, 0.0  ;;  %v822_v11 = vmax.f32 %v758_v24, 0.0  ;;  %1719 = vmatpush3.msra.mxu1 %v2488_v10 }
  0xfd   :  { %v446_v63 = vadd.f32 %v382_v20, %v218_v49  ;;  %v447_v36 = vadd.f32 %v383_v25, %v219_v37  ;;  %v448_v45 = vadd.f32 %v384_v41, %v220_v54  ;;  %v449_v48 = vadd.f32 %v385_v42, %v221_v19 }
  0xfe   :  { %1032 = vmatprep.mubr.f32.mxu0 %v821_v55  ;;  %1177 = vmatprep.mubr.f32.mxu1 %v823_v8 }
  0xff   :  { %v512_v39 = vpop.permute.xlu1 %511  ;;  %1033 = vmatmul.mubr.f32.gmra.mxu0 %v820_v18  ;;  %1178 = vmatmul.mubr.f32.gmra.mxu1 %v822_v11 }
 0x100   :  { %v610_v26 = vmul.f32 %v2134_v56, %v512_v39  ;;  %v611_v32 = vmul.f32 %v2142_v61, %v512_v39  ;;  %v612_v62 = vmul.f32 %v2140_v60, %v512_v39  ;;  %v613_v22 = vmul.f32 %v2147_v2, %v512_v39 }
 0x102   :  { %v675_v17 = vadd.f32 %v611_v32, %v447_v36  ;;  %v677_v14 = vadd.f32 %v613_v22, %v449_v48  ;;  %v674_v35 = vadd.f32 %v610_v26, %v446_v63  ;;  %v676_v9 = vadd.f32 %v612_v62, %v448_v45 }
 0x104   :  { %v288_v33 = vpop.permute.xlu1 %287  ;;  %v761_v59 = vadd.f32 %v2150_v3, %v675_v17  ;;  %v763_v15 = vadd.f32 %v2152_v4, %v677_v14  ;;  %v760_v27 = vadd.f32 %v2154_v5, %v674_v35  ;;  %v762_v28 = vadd.f32 %v2168_v13, %v676_v9 }
 0x105   :  { %v386_v57 = vmul.f32 %v2127_v52, %v288_v33  ;;  %v387_v50 = vmul.f32 %v2119_v46, %v288_v33  ;;  %v388_v58 = vmul.f32 %v2129_v53, %v288_v33  ;;  %v389_v51 = vmul.f32 %v2121_v47, %v288_v33 }
 0x106   :  { %v825_v23 = vmax.f32 %v761_v59, 0.0  ;;  %v827_v29 = vmax.f32 %v763_v15, 0.0  ;;  %v824_v20 = vmax.f32 %v760_v27, 0.0  ;;  %v826_v31 = vmax.f32 %v762_v28, 0.0 }
 0x107   :  { %v450_v12 = vadd.f32 %v386_v57, %v222_v7  ;;  %v451_v38 = vadd.f32 %v387_v50, %v223_v34  ;;  %v452_v52 = vadd.f32 %v388_v58, %v224_v16  ;;  %v453_v21 = vadd.f32 %v389_v51, %v225_v1 }
 0x108   :  { %1037 = vmatprep.mubr.f32.mxu0 %v825_v23  ;;  %1182 = vmatprep.mubr.f32.mxu1 %v827_v29 }
 0x109   :  { %v516_v30 = vpop.permute.xlu1 %515  ;;  %1038 = vmatmul.mubr.f32.gmra.mxu0 %v824_v20  ;;  %1183 = vmatmul.mubr.f32.gmra.mxu1 %v826_v31 }
 0x10a   :  { %v614_v46 = vmul.f32 %v2134_v56, %v516_v30  ;;  %v615_v47 = vmul.f32 %v2142_v61, %v516_v30  ;;  %v616_v53 = vmul.f32 %v2140_v60, %v516_v30  ;;  %v617_v25 = vmul.f32 %v2147_v2, %v516_v30 }
 0x10c   :  { %v678_v41 = vadd.f32 %v614_v46, %v450_v12  ;;  %v679_v42 = vadd.f32 %v615_v47, %v451_v38  ;;  %v680_v10 = vadd.f32 %v616_v53, %v452_v52  ;;  %v681_v43 = vadd.f32 %v617_v25, %v453_v21 }
 0x10e   :  { %v765_v40 = vadd.f32 %v2150_v3, %v679_v42  ;;  %v767_v44 = vadd.f32 %v2152_v4, %v681_v43  ;;  %v764_v6 = vadd.f32 %v2154_v5, %v678_v41  ;;  %v766_v24 = vadd.f32 %v2168_v13, %v680_v10  ;;  %v2542_v3 = vld [vmem:[%s2591_s4] ss:$0 sm:$0xff] }
 0x110   :  { %v829_v49 = vmax.f32 %v765_v40, 0.0  ;;  %v831_v56 = vmax.f32 %v767_v44, 0.0  ;;  %v828_v37 = vmax.f32 %v764_v6, 0.0  ;;  %v830_v61 = vmax.f32 %v766_v24, 0.0 }
 0x112   :  { %1042 = vmatprep.mubr.f32.mxu0 %v829_v49  ;;  %1187 = vmatprep.mubr.f32.mxu1 %v831_v56 }
 0x113   :  { %1043 = vmatmul.mubr.f32.gmra.mxu0 %v828_v37  ;;  %1188 = vmatmul.mubr.f32.gmra.mxu1 %v830_v61 }
 0x161   :  { %v1512_v60 = vpop.f32.mrf.mxu0  ;;  %v1592_v2 = vpop.f32.mrf.mxu1 }
 0x163   :  { %v1513_v4 = vpop.f32.mrf.mxu0  ;;  %v1593_v54 = vpop.f32.mrf.mxu1 }
 0x164   :  { %v1514_v5 = vadd.f32 %v1513_v4, %v1512_v60  ;;  %v1594_v8 = vadd.f32 %v1593_v54, %v1592_v2 }
 0x165   :  { %v1515_v19 = vpop.f32.mrf.mxu0  ;;  %v1595_v13 = vpop.f32.mrf.mxu1 }
 0x166   :  { %v970_v55 = vadd.f32 %v1514_v5, %v2542_v3 }
 0x167   :  { %v1516_v18 = vpop.f32.mrf.mxu0  ;;  %v1596_v11 = vpop.f32.mrf.mxu1 }
 0x168   :  { %v1115_v63 = vadd.f32 %v1594_v8, %v970_v55  ;;  %v1517_v36 = vadd.f32 %v1516_v18, %v1515_v19  ;;  %v1597_v32 = vadd.f32 %v1596_v11, %v1595_v13 }
 0x169   :  { %v1518_v45 = vpop.f32.mrf.mxu0  ;;  %v1598_v48 = vpop.f32.mrf.mxu1 }
 0x16a   :  { %v1193_v39 = vmax.f32 %v1115_v63, 0.0  ;;  %v975_v26 = vadd.f32 %v1517_v36, %v2542_v3 }
 0x16b   :  { %v1519_v62 = vpop.f32.mrf.mxu0  ;;  %v1599_v22 = vpop.f32.mrf.mxu1 }
 0x16c   :  { %v1120_v0 = vadd.f32 %v1597_v32, %v975_v26  ;;  %v1520_v17 = vadd.f32 %v1519_v62, %v1518_v45  ;;  %1680 = vmatprep.mubr.msk.f32.mxu0 %vm1224_vm0, %v1193_v39  ;;  %v1600_v7 = vadd.f32 %v1599_v22, %v1598_v48 }
 0x16d   :  { %v1521_v14 = vpop.f32.mrf.mxu0 }
 0x16e   :  { %v1194_v35 = vmax.f32 %v1120_v0, 0.0  ;;  %v980_v9 = vadd.f32 %v1520_v17, %v2542_v3  ;;  %v1601_v34 = vpop.f32.mrf.mxu1 }
 0x16f   :  { %v1522_v16 = vpop.f32.mrf.mxu0 }
 0x170   :  { %v1125_v1 = vadd.f32 %v1600_v7, %v980_v9  ;;  %v1523_v33 = vadd.f32 %v1522_v16, %v1521_v14  ;;  %1681 = vmatmul.mubr.msk.f32.vlgmr.msra.gmra.mxu0 %vm1224_vm0, %v1194_v35  ;;  %v1602_v59 = vpop.f32.mrf.mxu1 }
 0x171   :  { %v1603_v28 = vadd.f32 %v1602_v59, %v1601_v34  ;;  %v1524_v50 = vpop.f32.mrf.mxu0 }
 0x172   :  { %v1195_v15 = vmax.f32 %v1125_v1, 0.0  ;;  %v985_v27 = vadd.f32 %v1523_v33, %v2542_v3 }
 0x173   :  { %v1525_v23 = vpop.f32.mrf.mxu0 }
 0x174   :  { %v1130_v57 = vadd.f32 %v1603_v28, %v985_v27  ;;  %v1604_v58 = vpop.f32.mrf.mxu1  ;;  %1683 = vmatprep.mubr.msk.f32.mxu0 %vm1224_vm0, %v1195_v15  ;;  %v1526_v20 = vadd.f32 %v1525_v23, %v1524_v50 }
 0x176   :  { %v1196_v51 = vmax.f32 %v1130_v57, 0.0  ;;  %v1605_v29 = vpop.f32.mrf.mxu1  ;;  %v990_v12 = vadd.f32 %v1526_v20, %v2542_v3 }
 0x177   :  { %v1606_v30 = vadd.f32 %v1605_v29, %v1604_v58 }
 0x178   :  { %1684 = vmatmul.mubr.msk.f32.gmra.mxu0 %vm1224_vm0, %v1196_v51 }
 0x179   :  { %v1527_v31 = vpop.f32.mrf.mxu0  ;;  %v1607_v38 = vpop.f32.mrf.mxu1  ;;  %v1135_v21 = vadd.f32 %v1606_v30, %v990_v12 }
 0x17b   :  { %v1528_v52 = vpop.f32.mrf.mxu0  ;;  %v1608_v47 = vpop.f32.mrf.mxu1  ;;  %v1197_v53 = vmax.f32 %v1135_v21, 0.0 }
 0x17c   :  { %v1529_v46 = vadd.f32 %v1528_v52, %v1527_v31  ;;  %v1609_v41 = vadd.f32 %v1608_v47, %v1607_v38 }
 0x17d   :  { %1686 = vmatprep.mubr.msk.f32.mxu0 %vm1224_vm0, %v1197_v53 }
 0x17e   :  { %v995_v25 = vadd.f32 %v1529_v46, %v2542_v3 }
 0x180   :  { %v1140_v42 = vadd.f32 %v1609_v41, %v995_v25  ;;  %v1530_v10 = vpop.f32.mrf.mxu0 }
 0x181   :  { %v1610_v44 = vpop.f32.mrf.mxu1 }
 0x182   :  { %v1198_v43 = vmax.f32 %v1140_v42, 0.0  ;;  %v1531_v40 = vpop.f32.mrf.mxu0 }
 0x183   :  { %v1532_v6 = vadd.f32 %v1531_v40, %v1530_v10  ;;  %v1611_v49 = vpop.f32.mrf.mxu1 }
 0x184   :  { %1687 = vmatmul.mubr.msk.f32.gmra.mxu0 %vm1224_vm0, %v1198_v43  ;;  %v1612_v56 = vadd.f32 %v1611_v49, %v1610_v44 }
 0x185   :  { %v1000_v24 = vadd.f32 %v1532_v6, %v2542_v3 }
 0x187   :  { %v1145_v37 = vadd.f32 %v1612_v56, %v1000_v24 }
 0x189   :  { %v1199_v61 = vmax.f32 %v1145_v37, 0.0 }
 0x18a   :  { %v1533_v60 = vpop.f32.mrf.mxu0 }
 0x18b   :  { %v1613_v2 = vpop.f32.mrf.mxu1  ;;  %1689 = vmatprep.mubr.msk.f32.mxu0 %vm1224_vm0, %v1199_v61 }
 0x18c   :  { %v1534_v4 = vpop.f32.mrf.mxu0 }
 0x18d   :  { %v1535_v54 = vadd.f32 %v1534_v4, %v1533_v60  ;;  %v1614_v5 = vpop.f32.mrf.mxu1 }
 0x18e   :  { %v1615_v13 = vadd.f32 %v1614_v5, %v1613_v2 }
 0x18f   :  { %v1005_v19 = vadd.f32 %v1535_v54, %v2542_v3 }
 0x191   :  { %v1150_v55 = vadd.f32 %v1615_v13, %v1005_v19 }
 0x192   :  { %v1536_v8 = vpop.f32.mrf.mxu0  ;;  %v1616_v18 = vpop.f32.mrf.mxu1 }
 0x193   :  { %v1200_v11 = vmax.f32 %v1150_v55, 0.0 }
 0x194   :  { %v1537_v63 = vpop.f32.mrf.mxu0  ;;  %v1617_v36 = vpop.f32.mrf.mxu1 }
 0x195   :  { %v1538_v45 = vadd.f32 %v1537_v63, %v1536_v8  ;;  %1690 = vmatmul.mubr.msk.f32.gmra.mxu0 %vm1224_vm0, %v1200_v11  ;;  %v1618_v39 = vadd.f32 %v1617_v36, %v1616_v18 }
 0x197   :  { %v1010_v48 = vadd.f32 %v1538_v45, %v2542_v3 }
 0x199   :  { %v1155_v26 = vadd.f32 %v1618_v39, %v1010_v48 }
 0x19b   :  { %v1201_v32 = vmax.f32 %v1155_v26, 0.0 }
 0x19c   :  { %v1539_v62 = vpop.f32.mrf.mxu0  ;;  %v1619_v22 = vpop.f32.mrf.mxu1 }
 0x19d   :  { %1692 = vmatprep.mubr.msk.f32.mxu1 %vm1224_vm0, %v1201_v32 }
 0x19e   :  { %v1540_v0 = vpop.f32.mrf.mxu0  ;;  %v1620_v17 = vpop.f32.mrf.mxu1 }
 0x19f   :  { %v1541_v14 = vadd.f32 %v1540_v0, %v1539_v62  ;;  %v1621_v9 = vadd.f32 %v1620_v17, %v1619_v22  ;;  %v1463_v22 = vld [vmem:[%s2592_s6] ss:$0 sm:$0xff] }
 0x1a1   :  { %v1015_v35 = vadd.f32 %v1541_v14, %v2542_v3 }
 0x1a3   :  { %v1160_v7 = vadd.f32 %v1621_v9, %v1015_v35 }
 0x1a5   :  { %v1202_v34 = vmax.f32 %v1160_v7, 0.0 }
 0x1a6   :  { %v1542_v16 = vpop.f32.mrf.mxu0  ;;  %v1622_v1 = vpop.f32.mrf.mxu1 }
 0x1a7   :  { %1693 = vmatmul.mubr.msk.f32.vlgmr.msra.gmra.mxu1 %vm1224_vm0, %v1202_v34 }
 0x1a8   :  { %v1543_v33 = vpop.f32.mrf.mxu0  ;;  %v1623_v59 = vpop.f32.mrf.mxu1 }
 0x1a9   :  { %v1544_v15 = vadd.f32 %v1543_v33, %v1542_v16  ;;  %v1624_v28 = vadd.f32 %v1623_v59, %v1622_v1 }
 0x1ab   :  { %v1020_v27 = vadd.f32 %v1544_v15, %v2542_v3 }
 0x1ad   :  { %v1165_v57 = vadd.f32 %v1624_v28, %v1020_v27  ;;  %v1545_v50 = vpop.f32.mrf.mxu0 }
 0x1ae   :  { %v1625_v51 = vpop.f32.mrf.mxu1 }
 0x1af   :  { %v1203_v58 = vmax.f32 %v1165_v57, 0.0  ;;  %v1546_v23 = vpop.f32.mrf.mxu0 }
 0x1b0   :  { %v1547_v29 = vadd.f32 %v1546_v23, %v1545_v50  ;;  %v1626_v20 = vpop.f32.mrf.mxu1 }
 0x1b1   :  { %1695 = vmatprep.mubr.msk.f32.mxu1 %vm1224_vm0, %v1203_v58  ;;  %v1627_v12 = vadd.f32 %v1626_v20, %v1625_v51 }
 0x1b2   :  { %v1025_v31 = vadd.f32 %v1547_v29, %v2542_v3 }
 0x1b4   :  { %v1170_v30 = vadd.f32 %v1627_v12, %v1025_v31 }
 0x1b6   :  { %v1204_v38 = vmax.f32 %v1170_v30, 0.0 }
 0x1b7   :  { %v1548_v52 = vpop.f32.mrf.mxu0 }
 0x1b8   :  { %v1628_v21 = vpop.f32.mrf.mxu1  ;;  %1696 = vmatmul.mubr.msk.f32.gmra.mxu1 %vm1224_vm0, %v1204_v38 }
 0x1b9   :  { %v1549_v46 = vpop.f32.mrf.mxu0 }
 0x1ba   :  { %v1550_v47 = vadd.f32 %v1549_v46, %v1548_v52  ;;  %v1629_v53 = vpop.f32.mrf.mxu1 }
 0x1bb   :  { %v1630_v41 = vadd.f32 %v1629_v53, %v1628_v21 }
 0x1bc   :  { %v1030_v25 = vadd.f32 %v1550_v47, %v2542_v3 }
 0x1be   :  { %v1175_v42 = vadd.f32 %v1630_v41, %v1030_v25  ;;  %v2600_v25 = vmov 2  }
 0x1bf   :  { %v1551_v10 = vpop.f32.mrf.mxu0  ;;  %v1631_v43 = vpop.f32.mrf.mxu1 }
 0x1c0   :  { %v1205_v40 = vmax.f32 %v1175_v42, 0.0 }
 0x1c1   :  { %v1552_v44 = vpop.f32.mrf.mxu0  ;;  %v1632_v6 = vpop.f32.mrf.mxu1 }
 0x1c2   :  { %v1553_v24 = vadd.f32 %v1552_v44, %v1551_v10  ;;  %1698 = vmatprep.mubr.msk.f32.mxu1 %vm1224_vm0, %v1205_v40  ;;  %v1633_v56 = vadd.f32 %v1632_v6, %v1631_v43 }
 0x1c4   :  { %v1035_v49 = vadd.f32 %v1553_v24, %v2542_v3 }
 0x1c6   :  { %v1180_v37 = vadd.f32 %v1633_v56, %v1035_v49 }
 0x1c8   :  { %v1206_v61 = vmax.f32 %v1180_v37, 0.0 }
 0x1c9   :  { %v1554_v60 = vpop.f32.mrf.mxu0  ;;  %v1634_v2 = vpop.f32.mrf.mxu1 }
 0x1ca   :  { %1699 = vmatmul.mubr.msk.f32.gmra.mxu1 %vm1224_vm0, %v1206_v61 }
 0x1cb   :  { %v1555_v4 = vpop.f32.mrf.mxu0  ;;  %v1635_v54 = vpop.f32.mrf.mxu1 }
 0x1cc   :  { %v1556_v5 = vadd.f32 %v1555_v4, %v1554_v60  ;;  %v1636_v13 = vadd.f32 %v1635_v54, %v1634_v2 }
 0x1ce   :  { %v1040_v19 = vadd.f32 %v1556_v5, %v2542_v3 }
 0x1d0   :  { %v1185_v55 = vadd.f32 %v1636_v13, %v1040_v19 }
 0x1d2   :  { %v1207_v8 = vmax.f32 %v1185_v55, 0.0 }
 0x1d3   :  { %v1557_v18 = vpop.f32.mrf.mxu0  ;;  %v1637_v11 = vpop.f32.mrf.mxu1 }
 0x1d4   :  { %1701 = vmatprep.mubr.msk.f32.mxu1 %vm1224_vm0, %v1207_v8 }
 0x1d5   :  { %v1558_v63 = vpop.f32.mrf.mxu0  ;;  %v1638_v36 = vpop.f32.mrf.mxu1 }
 0x1d6   :  { %v1559_v45 = vadd.f32 %v1558_v63, %v1557_v18  ;;  %v1639_v39 = vadd.f32 %v1638_v36, %v1637_v11 }
 0x1d8   :  { %v1045_v48 = vadd.f32 %v1559_v45, %v2542_v3 }
 0x1da   :  { %v1190_v26 = vadd.f32 %v1639_v39, %v1045_v48 }
 0x1dc   :  { %v1208_v32 = vmax.f32 %v1190_v26, 0.0 }
 0x1de   :  { %1702 = vmatmul.mubr.msk.f32.gmra.mxu1 %vm1224_vm0, %v1208_v32 }
 0x230   :  { %v1682_v62 = vpop.f32.mrf.mxu0 }
 0x231   :  { %v1345_v14 = vadd.f32 %v1682_v62, %v1463_v22 }
 0x232   :  { %v1339_v0 = vpop.f32.mrf.mxu0 }
 0x233   :  { %v1340_v17 = vadd.f32 %v1463_v22, %v1339_v0 }
 0x235   :  { %1418 = vxpose.xlu0.b32.start [1/16] (narrow) %v1340_v17, 8 }
 0x238   :  { %v1685_v35 = vpop.f32.mrf.mxu0 }
 0x239   :  { %1419 = vxpose.xlu0.b32.cont [2/16] (narrow) %v1345_v14, 8  ;;  %v1355_v3 = vadd.f32 %v1685_v35, %v1463_v22 }
 0x23a   :  { %v1349_v9 = vpop.f32.mrf.mxu0 }
 0x23b   :  { %v1350_v7 = vadd.f32 %v1463_v22, %v1349_v9 }
 0x23d   :  { %1420 = vxpose.xlu0.b32.cont [3/16] (narrow) %v1350_v7, 8 }
 0x241   :  { %1421 = vxpose.xlu0.b32.cont [4/16] (narrow) %v1355_v3, 8 }
 0x244   :  { %v1688_v34 = vpop.f32.mrf.mxu0 }
 0x245   :  { %v1365_v33 = vadd.f32 %v1688_v34, %v1463_v22 }
 0x246   :  { %v1359_v16 = vpop.f32.mrf.mxu0 }
 0x247   :  { %v1360_v1 = vadd.f32 %v1463_v22, %v1359_v16 }
 0x249   :  { %1422 = vxpose.xlu0.b32.cont [5/16] (narrow) %v1360_v1, 8 }
 0x24d   :  { %1423 = vxpose.xlu0.b32.cont [6/16] (narrow) %v1365_v33, 8 }
 0x255   :  { %v1691_v59 = vpop.f32.mrf.mxu0 }
 0x256   :  { %v1375_v28 = vadd.f32 %v1691_v59, %v1463_v22 }
 0x257   :  { %v1369_v15 = vpop.f32.mrf.mxu0 }
 0x258   :  { %v1370_v27 = vadd.f32 %v1463_v22, %v1369_v15 }
 0x25a   :  { %1424 = vxpose.xlu0.b32.cont [7/16] (narrow) %v1370_v27, 8 }
 0x25e   :  { %1425 = vxpose.xlu0.b32.cont [8/16] (narrow) %v1375_v28, 8 }
 0x267   :  { %v1694_v57 = vpop.f32.mrf.mxu1 }
 0x268   :  { %v1385_v51 = vadd.f32 %v1694_v57, %v1463_v22 }
 0x269   :  { %v1379_v50 = vpop.f32.mrf.mxu1 }
 0x26a   :  { %v1380_v58 = vadd.f32 %v1463_v22, %v1379_v50 }
 0x26c   :  { %1426 = vxpose.xlu0.b32.cont [9/16] (narrow) %v1380_v58, 8 }
 0x270   :  { %1427 = vxpose.xlu0.b32.cont [10/16] (narrow) %v1385_v51, 8 }
 0x278   :  { %v1697_v23 = vpop.f32.mrf.mxu1 }
 0x279   :  { %v1395_v31 = vadd.f32 %v1697_v23, %v1463_v22 }
 0x27a   :  { %v1389_v29 = vpop.f32.mrf.mxu1 }
 0x27b   :  { %v1390_v20 = vadd.f32 %v1463_v22, %v1389_v29 }
 0x27d   :  { %1428 = vxpose.xlu0.b32.cont [11/16] (narrow) %v1390_v20, 8 }
 0x281   :  { %1429 = vxpose.xlu0.b32.cont [12/16] (narrow) %v1395_v31, 8 }
 0x28a   :  { %v1700_v12 = vpop.f32.mrf.mxu1 }
 0x28b   :  { %v1405_v52 = vadd.f32 %v1700_v12, %v1463_v22 }
 0x28c   :  { %v1399_v30 = vpop.f32.mrf.mxu1 }
 0x28d   :  { %v1400_v38 = vadd.f32 %v1463_v22, %v1399_v30 }
 0x28f   :  { %1430 = vxpose.xlu0.b32.cont [13/16] (narrow) %v1400_v38, 8 }
 0x293   :  { %1431 = vxpose.xlu0.b32.cont [14/16] (narrow) %v1405_v52, 8 }
 0x29e   :  { %v1703_v21 = vpop.f32.mrf.mxu1 }
 0x29f   :  { %v1415_v53 = vadd.f32 %v1703_v21, %v1463_v22 }
 0x2a0   :  { %v1409_v46 = vpop.f32.mrf.mxu1 }
 0x2a1   :  { %v1410_v47 = vadd.f32 %v1463_v22, %v1409_v46 }
 0x2a3   :  { %1432 = vxpose.xlu0.b32.cont [15/16] (narrow) %v1410_v47, 8 }
 0x2a7   :  { %1433 = vxpose.xlu0.b32.end [16/16] (narrow) %v1415_v53, 8 }
 0x2d0   :  { %1759 = vset.pattern.permute.xlu0 %v2600_v25 }
 0x2e7   :  { %v1434_v41 = vpop.trf.xlu0 }
 0x2e8   :  { %1760 = vtanh.f32 %v1434_v41  ;;  %v1452_v42 = vmax.f32 %v1434_v41, -20.0 }
 0x2ea   :  { %v1453_v10 = vmin.f32 %v1452_v42, 2.0 }
 0x2ec   :  { %v1455_v43 = vmul.f32 1.442695, %v1453_v10 }
 0x2ee   :  { %1762 = vpow2.f32 %v1455_v43 }
 0x2f5   :  { %v1761_v40 = vpop.eup %1760 }
 0x2f6   :  { %v1451_v44 = vmul.f32 2.0, %v1761_v40 }
 0x2f8   :  { %1454 = vst [vmem:[%s2593_s7] sm:$0x1] %v1451_v44 }
 0x2fb   :  { %v1763_v6 = vpop.eup %1762 }
 0x2fc   :  { %1457 = vst [vmem:[%s2593_s7] sm:$0x2] %v1763_v6 }

</bundles_post_ra>
